<compile_context>
chip_gen: v7x
topology: tpu7x:2x2x1
jax: 0.10.0
libtpu: 0.0.40
codegen_flags: <defaults>
</compile_context>

<pallas_src>
import jax
import jax.numpy as jnp
from jax.experimental import pallas as pl
from jax.experimental.pallas import tpu as pltpu

EPS = 1e-5


def _round_up(x, m):
    return (x + m - 1) // m * m


# ----------------------------------------------------------------------------
# Fused kernel factory. Per grid step (one batch tile of Bt images):
#   x_ref  (Bt*HW, Cin)  bf16    s1/o1 (1, Cin) f32     w1 (Cin, Cmid) bf16
#   s2/o2  (1, Cmid) f32         w2 (9, Cmid, Cout_pad) bf16
#   o_ref  (1, Bt*(H+2)*(W+2), Cout_pad) bf16
#   ypad_ref scratch (pad_rows, Cmid) bf16  (stacked zero-padded activations)
# ----------------------------------------------------------------------------
def _make_fused_kernel(Bt, H, W, Cmid, Cout_pad):
    HW = H * W
    Wp = W + 2                  # padded row width (conv padding = 1)
    IMG = (H + 2) * Wp          # padded rows per image in the scratch
    M3 = Bt * IMG               # stage-3 matmul M == output-slab rows per step

    def kernel(x_ref, s1_ref, o1_ref, w1_ref, s2_ref, o2_ref, w2_ref,
               o_ref, ypad_ref):
        # Zero the padded scratch (bulk, aligned bf16 stores). Kept per-step so
        # the halo stays correct under multi-core "parallel" grid partitioning.
        ypad_ref[...] = jnp.zeros_like(ypad_ref)

        # --- Stage 1: BN1 affine + ReLU + single K=Cin 1x1 conv -------------
        # affine/ReLU in f32 (v5e has no bf16 VPU); matmul operands bf16.
        xb = jnp.maximum(x_ref[...].astype(jnp.float32) * s1_ref[...]
                         + o1_ref[...], 0.0)
        z = jnp.dot(xb.astype(jnp.bfloat16), w1_ref[...],
                    preferred_element_type=jnp.float32)       # (Bt*HW, Cmid) f32

        # --- BN2 affine + ReLU; one downcast to the bf16 scratch dtype ------
        y = jnp.maximum(z * s2_ref[...] + o2_ref[...], 0.0).astype(jnp.bfloat16)

        # --- Stage 2: scatter interiors of all Bt images into the padded ----
        # scratch (image b occupies rows [b*IMG, (b+1)*IMG)).
        for b in range(Bt):
            for h in range(H):
                dst = b * IMG + (h + 1) * Wp + 1
                src = b * HW + h * W
                ypad_ref[pl.ds(dst, W), :] = y[src:src + W, :]

        # --- Stage 3: 3x3 conv as 9 contiguous-window matmuls over all ------
        # images at once; local output row m = b*IMG + h*Wp + w reads
        # ypad[m + kh*Wp + kw] = padded(b, h+kh-1, w+kw-1).  Rows with w >= W
        # and the trailing 2*Wp rows per image are garbage, dropped in JAX.
        acc = jnp.dot(ypad_ref[pl.ds(0, M3), :], w2_ref[0],
                      preferred_element_type=jnp.float32)
        for t in range(1, 9):
            kh, kw = divmod(t, 3)
            win = ypad_ref[pl.ds(kh * Wp + kw, M3), :]
            acc = acc + jnp.dot(win, w2_ref[t],
                                preferred_element_type=jnp.float32)

        o_ref[0] = acc.astype(jnp.bfloat16)                    # lane-dense store

    return kernel


# ----------------------------------------------------------------------------
# Batch-tile / VMEM-budget helpers (review items #2, #8, #9).
# ----------------------------------------------------------------------------
def _pick_batch_tile(B, H, W, Cin, Cmid, Cout_pad, budget_bytes=20 * 2**20):
    """Largest batch tile whose per-step footprint fits the budget, preferring
    to keep >= 4 grid steps (2 per TensorCore on v7x) when the batch allows."""
    HW, Wp = H * W, W + 2

    def step_bytes(bt):
        M3 = bt * (H + 2) * Wp
        pad_rows = _round_up(M3 + 2 * Wp + 2, 16)
        return (2 * bt * HW * Cin * 2        # x block, bf16, double-buffered
                + 2 * M3 * Cout_pad * 2      # out block, bf16, double-buffered
                + pad_rows * Cmid * 2)       # bf16 scratch

    divisors = [d for d in range(1, B + 1)
                if B % d == 0 and step_bytes(d) <= budget_bytes]
    if not divisors:
        return 1
    big_grid = [d for d in divisors if B // d >= 4]
    return max(big_grid) if big_grid else max(divisors)


def _vmem_limit_bytes(bt, H, W, Cin, Cmid, Cout_pad):
    HW, Wp = H * W, W + 2
    M3 = bt * (H + 2) * Wp
    pad_rows = _round_up(M3 + 2 * Wp + 2, 16)
    req = (2 * bt * HW * Cin * 2                     # x (double-buffered)
           + 2 * M3 * Cout_pad * 2                   # out (double-buffered)
           + 2 * (Cin * Cmid + 9 * Cmid * Cout_pad) * 2   # weights
           + 2 * 2 * (Cin + Cmid) * 4                # BN affines
           + pad_rows * Cmid * 2)                    # scratch
    # 2x headroom for compiler-internal scratch, capped at v7x's 64 MiB VMEM.
    return int(min(64 * 2**20, max(32 * 2**20, 2 * req)))


# ----------------------------------------------------------------------------
# Wrapper: layout plumbing (NCHW<->NHWC, BN folding, weight packing) in JAX.
# ----------------------------------------------------------------------------
def dense_layer_cob_forward(prev_features, params):
    if not isinstance(prev_features, (list, tuple)):
        prev_features = [prev_features]
    xs = [jnp.asarray(x) for x in prev_features]
    out_dtype = xs[0].dtype
    B, _, H, W = xs[0].shape
    HW, Wp = H * W, W + 2

    g1, b1, m1, v1 = [jnp.asarray(t, jnp.float32) for t in params["norm1"]]
    g2, b2, m2, v2 = [jnp.asarray(t, jnp.float32) for t in params["norm2"]]
    conv1_w = jnp.asarray(params["conv1"], jnp.float32)     # (Cmid, Cin, 1, 1) OIHW
    conv2_w = jnp.asarray(params["conv2"], jnp.float32)     # (Cout, Cmid, 3, 3) OIHW
    Cmid, Cin = int(conv1_w.shape[0]), int(conv1_w.shape[1])
    Cout = int(conv2_w.shape[0])
    assert sum(int(x.shape[1]) for x in xs) == Cin

    # Fold eval-mode BatchNorm into per-channel affines (f32).
    s1 = g1 / jnp.sqrt(v1 + EPS)
    o1 = b1 - m1 * s1
    s2 = g2 / jnp.sqrt(v2 + EPS)
    o2 = b2 - m2 * s2

    # DenseNet concat fused into the (already required) layout copy:
    # NCHW -> (B*HW, C) per feature, concat channels once, single bf16 copy.
    x_cat = jnp.concatenate(
        [jnp.transpose(x, (0, 2, 3, 1)).reshape(B * HW, int(x.shape[1]))
         for x in xs],
        axis=1).astype(jnp.bfloat16)                          # (B*HW, Cin)

    # 1x1 weight -> (Cin, Cmid) bf16; 3x3 weight -> (9, Cmid, Cout_pad) bf16.
    w1 = jnp.transpose(conv1_w[:, :, 0, 0], (1, 0)).astype(jnp.bfloat16)
    Cout_pad = _round_up(Cout, 128)                           # lane-dense N
    w2 = jnp.transpose(conv2_w, (2, 3, 1, 0)).reshape(9, Cmid, Cout)
    w2 = jnp.pad(w2, ((0, 0), (0, 0), (0, Cout_pad - Cout))).astype(jnp.bfloat16)

    bt = _pick_batch_tile(B, H, W, Cin, Cmid, Cout_pad)
    steps = B // bt
    IMG = (H + 2) * Wp
    M3 = bt * IMG
    # Last tap window reads up to row M3 + 2*Wp + 1; round to bf16 packing.
    pad_rows = _round_up(M3 + 2 * Wp + 2, 16)

    kernel = _make_fused_kernel(bt, H, W, Cmid, Cout_pad)
    out_pad = pl.pallas_call(
        kernel,
        out_shape=jax.ShapeDtypeStruct((steps, M3, Cout_pad), jnp.bfloat16),
        grid=(steps,),
        in_specs=[
            pl.BlockSpec((bt * HW, Cin), lambda i: (i, 0)),     # x
            pl.BlockSpec((1, Cin), lambda i: (0, 0)),           # s1
            pl.BlockSpec((1, Cin), lambda i: (0, 0)),           # o1
            pl.BlockSpec((Cin, Cmid), lambda i: (0, 0)),         # w1
            pl.BlockSpec((1, Cmid), lambda i: (0, 0)),           # s2
            pl.BlockSpec((1, Cmid), lambda i: (0, 0)),           # o2
            pl.BlockSpec((9, Cmid, Cout_pad), lambda i: (0, 0, 0)),  # w2
        ],
        out_specs=pl.BlockSpec((1, M3, Cout_pad), lambda i: (i, 0, 0)),
        scratch_shapes=[pltpu.VMEM((pad_rows, Cmid), jnp.bfloat16)],
        compiler_params=pltpu.CompilerParams(
            dimension_semantics=("parallel",),
            vmem_limit_bytes=_vmem_limit_bytes(bt, H, W, Cin, Cmid, Cout_pad)),
    )(x_cat, s1[None, :], o1[None, :], w1, s2[None, :], o2[None, :], w2)

    # Drop per-image trailing pad rows, w>=W garbage columns and Cout lane pad;
    # back to NCHW.  drop_rate = 0.0 -> dropout is identity.
    out = out_pad.reshape(steps, bt, H + 2, Wp, Cout_pad)[:, :, :H, :W, :Cout]
    out = out.reshape(B, H, W, Cout)
    return jnp.transpose(out, (0, 3, 1, 2)).astype(out_dtype)


# ----------------------------------------------------------------------------
# Pure-JAX reference (NCHW, f32 highest precision) for correctness check.
# ----------------------------------------------------------------------------
def _reference(inputs, params):
    x = jnp.concatenate(inputs, axis=1)

    def bn(x, g, b, m, v):
        sh = (1, -1, 1, 1)
        return (x - m.reshape(sh)) / jnp.sqrt(v.reshape(sh) + EPS) * g.reshape(sh) + b.reshape(sh)

    g1, b1, m1, v1 = params["norm1"]
    g2, b2, m2, v2 = params["norm2"]
    h = jax.nn.relu(bn(x, g1, b1, m1, v1))
    h = jax.lax.conv_general_dilated(h, params["conv1"], (1, 1), "VALID",
                                     dimension_numbers=("NCHW", "OIHW", "NCHW"),
                                     precision=jax.lax.Precision.HIGHEST)
    h = jax.nn.relu(bn(h, g2, b2, m2, v2))
    h = jax.lax.conv_general_dilated(h, params["conv2"], (1, 1), ((1, 1), (1, 1)),
                                     dimension_numbers=("NCHW", "OIHW", "NCHW"),
                                     precision=jax.lax.Precision.HIGHEST)
    return h


if __name__ == "__main__":
    # Module hyper-params (small, consistent with a DenseNet layer).
    B, Hs, Ws = 2, 8, 8
    growth_rate, bn_size = 32, 4
    num_input_features = 64            # channels after concat of prev features
    Cmid = bn_size * growth_rate       # 128
    Cout = growth_rate                 # 32

    key = jax.random.PRNGKey(0)
    ks = jax.random.split(key, 12)

    params = {
        "norm1": (
            1.0 + 0.1 * jax.random.normal(ks[0], (num_input_features,), jnp.float32),
            0.1 * jax.random.normal(ks[1], (num_input_features,), jnp.float32),
            0.05 * jax.random.normal(ks[2], (num_input_features,), jnp.float32),
            1.0 + 0.1 * jnp.abs(jax.random.normal(ks[3], (num_input_features,), jnp.float32)),
        ),
        "conv1": 0.05 * jax.random.normal(ks[4], (Cmid, num_input_features, 1, 1), jnp.float32),
        "norm2": (
            1.0 + 0.1 * jax.random.normal(ks[5], (Cmid,), jnp.float32),
            0.1 * jax.random.normal(ks[6], (Cmid,), jnp.float32),
            0.05 * jax.random.normal(ks[7], (Cmid,), jnp.float32),
            1.0 + 0.1 * jnp.abs(jax.random.normal(ks[8], (Cmid,), jnp.float32)),
        ),
        "conv2": 0.05 * jax.random.normal(ks[9], (Cout, Cmid, 3, 3), jnp.float32),
    }

    # prev_features: list of two NCHW tensors, channels sum to num_input_features.
    x0 = jax.random.normal(ks[10], (B, num_input_features // 2, Hs, Ws), jnp.float32)
    x1 = jax.random.normal(ks[11], (B, num_input_features // 2, Hs, Ws), jnp.float32)
    prev_features = [x0, x1]

    out = dense_layer_cob_forward(prev_features, params)
    out = jax.block_until_ready(out)
    assert out.shape == (B, Cout, Hs, Ws), out.shape

    ref = jax.block_until_ready(_reference(prev_features, params))
    # bf16 activations / MXU operands / output (f32 accumulation) vs f32-HIGHEST
    # reference -> relaxed tolerance.
    assert jnp.allclose(out, ref, atol=3e-2, rtol=3e-2), float(jnp.max(jnp.abs(out - ref)))

    print("KERNEL_OK")
</pallas_src>

<mosaic_0001>
module attributes {stable_mosaic.version = 11 : i64} {
  func.func @kernel(%arg0: i32, %arg1: memref<128x64xbf16, #tpu.memory_space<vmem>>, %arg2: memref<1x64xf32, #tpu.memory_space<vmem>>, %arg3: memref<1x64xf32, #tpu.memory_space<vmem>>, %arg4: memref<64x128xbf16, #tpu.memory_space<vmem>>, %arg5: memref<1x128xf32, #tpu.memory_space<vmem>>, %arg6: memref<1x128xf32, #tpu.memory_space<vmem>>, %arg7: memref<9x128x128xbf16, #tpu.memory_space<vmem>>, %arg8: memref<1x200x128xbf16, #tpu.memory_space<vmem>>, %arg9: memref<224x128xbf16, #tpu.memory_space<vmem>>) attributes {dimension_semantics = [#tpu.dimension_semantics<parallel>], iteration_bounds = array<i64: 1>, scalar_prefetch = 0 : i64, scratch_operands = 1 : i64, tpu.core_type = #tpu.core_type<tc>, window_params = [{transform_indices = @transform_0, window_bounds = array<i64: 128, 64>}, {pipeline_mode = #tpu.pipeline_mode<synchronous>, transform_indices = @transform_1, window_bounds = array<i64: 1, 64>}, {pipeline_mode = #tpu.pipeline_mode<synchronous>, transform_indices = @transform_2, window_bounds = array<i64: 1, 64>}, {pipeline_mode = #tpu.pipeline_mode<synchronous>, transform_indices = @transform_3, window_bounds = array<i64: 64, 128>}, {pipeline_mode = #tpu.pipeline_mode<synchronous>, transform_indices = @transform_4, window_bounds = array<i64: 1, 128>}, {pipeline_mode = #tpu.pipeline_mode<synchronous>, transform_indices = @transform_5, window_bounds = array<i64: 1, 128>}, {pipeline_mode = #tpu.pipeline_mode<synchronous>, transform_indices = @transform_6, window_bounds = array<i64: 9, 128, 128>}, {transform_indices = @transform_7, window_bounds = array<i64: 1, 200, 128>}]} {
    %cst = arith.constant 0.000000e+00 : bf16
    %0 = vector.broadcast %cst : bf16 to vector<224x128xbf16>
    %c0 = arith.constant 0 : index
    %c0_0 = arith.constant 0 : index
    %1 = vector.load %arg9[%c0, %c0_0] : memref<224x128xbf16, #tpu.memory_space<vmem>>, vector<224x128xbf16>
    tpu.vector_store %arg9[%c0, %c0_0], %0 {strides = array<i32>} : memref<224x128xbf16, #tpu.memory_space<vmem>>, vector<224x128xbf16>,
    %c0_1 = arith.constant 0 : index
    %c0_2 = arith.constant 0 : index
    %2 = vector.load %arg1[%c0_1, %c0_2] : memref<128x64xbf16, #tpu.memory_space<vmem>>, vector<128x64xbf16>
    %3 = arith.extf %2 : vector<128x64xbf16> to vector<128x64xf32>
    %c0_3 = arith.constant 0 : index
    %c0_4 = arith.constant 0 : index
    %4 = vector.load %arg2[%c0_3, %c0_4] : memref<1x64xf32, #tpu.memory_space<vmem>>, vector<1x64xf32>
    %5 = vector.broadcast %4 : vector<1x64xf32> to vector<128x64xf32>
    %6 = arith.mulf %3, %5 : vector<128x64xf32>
    %c0_5 = arith.constant 0 : index
    %c0_6 = arith.constant 0 : index
    %7 = vector.load %arg3[%c0_5, %c0_6] : memref<1x64xf32, #tpu.memory_space<vmem>>, vector<1x64xf32>
    %8 = vector.broadcast %7 : vector<1x64xf32> to vector<128x64xf32>
    %9 = arith.addf %6, %8 : vector<128x64xf32>
    %cst_7 = arith.constant 0.000000e+00 : f32
    %10 = vector.broadcast %cst_7 : f32 to vector<128x64xf32>
    %11 = arith.maximumf %9, %10 : vector<128x64xf32>
    %12 = arith.truncf %11 : vector<128x64xf32> to vector<128x64xbf16>
    %c0_8 = arith.constant 0 : index
    %c0_9 = arith.constant 0 : index
    %13 = vector.load %arg4[%c0_8, %c0_9] : memref<64x128xbf16, #tpu.memory_space<vmem>>, vector<64x128xbf16>
    %cst_10 = arith.constant dense<0.000000e+00> : vector<128x128xf32>
    %14 = tpu.matmul %12, %13, %cst_10 {dimension_numbers = #tpu.dot_dimension_numbers<[1], [0], [0], [1], [0, 0, 1, 1], [], []>} : vector<128x64xbf16>, vector<64x128xbf16>, vector<128x128xf32> -> vector<128x128xf32>
    %c0_11 = arith.constant 0 : index
    %c0_12 = arith.constant 0 : index
    %15 = vector.load %arg5[%c0_11, %c0_12] : memref<1x128xf32, #tpu.memory_space<vmem>>, vector<1x128xf32>
    %16 = vector.broadcast %15 : vector<1x128xf32> to vector<128x128xf32>
    %17 = arith.mulf %14, %16 : vector<128x128xf32>
    %c0_13 = arith.constant 0 : index
    %c0_14 = arith.constant 0 : index
    %18 = vector.load %arg6[%c0_13, %c0_14] : memref<1x128xf32, #tpu.memory_space<vmem>>, vector<1x128xf32>
    %19 = vector.broadcast %18 : vector<1x128xf32> to vector<128x128xf32>
    %20 = arith.addf %17, %19 : vector<128x128xf32>
    %cst_15 = arith.constant 0.000000e+00 : f32
    %21 = vector.broadcast %cst_15 : f32 to vector<128x128xf32>
    %22 = arith.maximumf %20, %21 : vector<128x128xf32>
    %23 = arith.truncf %22 : vector<128x128xf32> to vector<128x128xbf16>
    %24 = vector.extract_strided_slice %23 {offsets = [0, 0], sizes = [8, 128], strides = [1, 1]} : vector<128x128xbf16> to vector<8x128xbf16>
    %c11 = arith.constant 11 : index
    %c0_16 = arith.constant 0 : index
    %25 = vector.load %arg9[%c11, %c0_16] : memref<224x128xbf16, #tpu.memory_space<vmem>>, vector<8x128xbf16>
    tpu.vector_store %arg9[%c11, %c0_16], %24 {strides = array<i32>} : memref<224x128xbf16, #tpu.memory_space<vmem>>, vector<8x128xbf16>,
    %26 = vector.extract_strided_slice %23 {offsets = [8, 0], sizes = [8, 128], strides = [1, 1]} : vector<128x128xbf16> to vector<8x128xbf16>
    %c21 = arith.constant 21 : index
    %c0_17 = arith.constant 0 : index
    %27 = vector.load %arg9[%c21, %c0_17] : memref<224x128xbf16, #tpu.memory_space<vmem>>, vector<8x128xbf16>
    tpu.vector_store %arg9[%c21, %c0_17], %26 {strides = array<i32>} : memref<224x128xbf16, #tpu.memory_space<vmem>>, vector<8x128xbf16>,
    %28 = vector.extract_strided_slice %23 {offsets = [16, 0], sizes = [8, 128], strides = [1, 1]} : vector<128x128xbf16> to vector<8x128xbf16>
    %c31 = arith.constant 31 : index
    %c0_18 = arith.constant 0 : index
    %29 = vector.load %arg9[%c31, %c0_18] : memref<224x128xbf16, #tpu.memory_space<vmem>>, vector<8x128xbf16>
    tpu.vector_store %arg9[%c31, %c0_18], %28 {strides = array<i32>} : memref<224x128xbf16, #tpu.memory_space<vmem>>, vector<8x128xbf16>,
    %30 = vector.extract_strided_slice %23 {offsets = [24, 0], sizes = [8, 128], strides = [1, 1]} : vector<128x128xbf16> to vector<8x128xbf16>
    %c41 = arith.constant 41 : index
    %c0_19 = arith.constant 0 : index
    %31 = vector.load %arg9[%c41, %c0_19] : memref<224x128xbf16, #tpu.memory_space<vmem>>, vector<8x128xbf16>
    tpu.vector_store %arg9[%c41, %c0_19], %30 {strides = array<i32>} : memref<224x128xbf16, #tpu.memory_space<vmem>>, vector<8x128xbf16>,
    %32 = vector.extract_strided_slice %23 {offsets = [32, 0], sizes = [8, 128], strides = [1, 1]} : vector<128x128xbf16> to vector<8x128xbf16>
    %c51 = arith.constant 51 : index
    %c0_20 = arith.constant 0 : index
    %33 = vector.load %arg9[%c51, %c0_20] : memref<224x128xbf16, #tpu.memory_space<vmem>>, vector<8x128xbf16>
    tpu.vector_store %arg9[%c51, %c0_20], %32 {strides = array<i32>} : memref<224x128xbf16, #tpu.memory_space<vmem>>, vector<8x128xbf16>,
    %34 = vector.extract_strided_slice %23 {offsets = [40, 0], sizes = [8, 128], strides = [1, 1]} : vector<128x128xbf16> to vector<8x128xbf16>
    %c61 = arith.constant 61 : index
    %c0_21 = arith.constant 0 : index
    %35 = vector.load %arg9[%c61, %c0_21] : memref<224x128xbf16, #tpu.memory_space<vmem>>, vector<8x128xbf16>
    tpu.vector_store %arg9[%c61, %c0_21], %34 {strides = array<i32>} : memref<224x128xbf16, #tpu.memory_space<vmem>>, vector<8x128xbf16>,
    %36 = vector.extract_strided_slice %23 {offsets = [48, 0], sizes = [8, 128], strides = [1, 1]} : vector<128x128xbf16> to vector<8x128xbf16>
    %c71 = arith.constant 71 : index
    %c0_22 = arith.constant 0 : index
    %37 = vector.load %arg9[%c71, %c0_22] : memref<224x128xbf16, #tpu.memory_space<vmem>>, vector<8x128xbf16>
    tpu.vector_store %arg9[%c71, %c0_22], %36 {strides = array<i32>} : memref<224x128xbf16, #tpu.memory_space<vmem>>, vector<8x128xbf16>,
    %38 = vector.extract_strided_slice %23 {offsets = [56, 0], sizes = [8, 128], strides = [1, 1]} : vector<128x128xbf16> to vector<8x128xbf16>
    %c81 = arith.constant 81 : index
    %c0_23 = arith.constant 0 : index
    %39 = vector.load %arg9[%c81, %c0_23] : memref<224x128xbf16, #tpu.memory_space<vmem>>, vector<8x128xbf16>
    tpu.vector_store %arg9[%c81, %c0_23], %38 {strides = array<i32>} : memref<224x128xbf16, #tpu.memory_space<vmem>>, vector<8x128xbf16>,
    %40 = vector.extract_strided_slice %23 {offsets = [64, 0], sizes = [8, 128], strides = [1, 1]} : vector<128x128xbf16> to vector<8x128xbf16>
    %c111 = arith.constant 111 : index
    %c0_24 = arith.constant 0 : index
    %41 = vector.load %arg9[%c111, %c0_24] : memref<224x128xbf16, #tpu.memory_space<vmem>>, vector<8x128xbf16>
    tpu.vector_store %arg9[%c111, %c0_24], %40 {strides = array<i32>} : memref<224x128xbf16, #tpu.memory_space<vmem>>, vector<8x128xbf16>,
    %42 = vector.extract_strided_slice %23 {offsets = [72, 0], sizes = [8, 128], strides = [1, 1]} : vector<128x128xbf16> to vector<8x128xbf16>
    %c121 = arith.constant 121 : index
    %c0_25 = arith.constant 0 : index
    %43 = vector.load %arg9[%c121, %c0_25] : memref<224x128xbf16, #tpu.memory_space<vmem>>, vector<8x128xbf16>
    tpu.vector_store %arg9[%c121, %c0_25], %42 {strides = array<i32>} : memref<224x128xbf16, #tpu.memory_space<vmem>>, vector<8x128xbf16>,
    %44 = vector.extract_strided_slice %23 {offsets = [80, 0], sizes = [8, 128], strides = [1, 1]} : vector<128x128xbf16> to vector<8x128xbf16>
    %c131 = arith.constant 131 : index
    %c0_26 = arith.constant 0 : index
    %45 = vector.load %arg9[%c131, %c0_26] : memref<224x128xbf16, #tpu.memory_space<vmem>>, vector<8x128xbf16>
    tpu.vector_store %arg9[%c131, %c0_26], %44 {strides = array<i32>} : memref<224x128xbf16, #tpu.memory_space<vmem>>, vector<8x128xbf16>,
    %46 = vector.extract_strided_slice %23 {offsets = [88, 0], sizes = [8, 128], strides = [1, 1]} : vector<128x128xbf16> to vector<8x128xbf16>
    %c141 = arith.constant 141 : index
    %c0_27 = arith.constant 0 : index
    %47 = vector.load %arg9[%c141, %c0_27] : memref<224x128xbf16, #tpu.memory_space<vmem>>, vector<8x128xbf16>
    tpu.vector_store %arg9[%c141, %c0_27], %46 {strides = array<i32>} : memref<224x128xbf16, #tpu.memory_space<vmem>>, vector<8x128xbf16>,
    %48 = vector.extract_strided_slice %23 {offsets = [96, 0], sizes = [8, 128], strides = [1, 1]} : vector<128x128xbf16> to vector<8x128xbf16>
    %c151 = arith.constant 151 : index
    %c0_28 = arith.constant 0 : index
    %49 = vector.load %arg9[%c151, %c0_28] : memref<224x128xbf16, #tpu.memory_space<vmem>>, vector<8x128xbf16>
    tpu.vector_store %arg9[%c151, %c0_28], %48 {strides = array<i32>} : memref<224x128xbf16, #tpu.memory_space<vmem>>, vector<8x128xbf16>,
    %50 = vector.extract_strided_slice %23 {offsets = [104, 0], sizes = [8, 128], strides = [1, 1]} : vector<128x128xbf16> to vector<8x128xbf16>
    %c161 = arith.constant 161 : index
    %c0_29 = arith.constant 0 : index
    %51 = vector.load %arg9[%c161, %c0_29] : memref<224x128xbf16, #tpu.memory_space<vmem>>, vector<8x128xbf16>
    tpu.vector_store %arg9[%c161, %c0_29], %50 {strides = array<i32>} : memref<224x128xbf16, #tpu.memory_space<vmem>>, vector<8x128xbf16>,
    %52 = vector.extract_strided_slice %23 {offsets = [112, 0], sizes = [8, 128], strides = [1, 1]} : vector<128x128xbf16> to vector<8x128xbf16>
    %c171 = arith.constant 171 : index
    %c0_30 = arith.constant 0 : index
    %53 = vector.load %arg9[%c171, %c0_30] : memref<224x128xbf16, #tpu.memory_space<vmem>>, vector<8x128xbf16>
    tpu.vector_store %arg9[%c171, %c0_30], %52 {strides = array<i32>} : memref<224x128xbf16, #tpu.memory_space<vmem>>, vector<8x128xbf16>,
    %54 = vector.extract_strided_slice %23 {offsets = [120, 0], sizes = [8, 128], strides = [1, 1]} : vector<128x128xbf16> to vector<8x128xbf16>
    %c181 = arith.constant 181 : index
    %c0_31 = arith.constant 0 : index
    %55 = vector.load %arg9[%c181, %c0_31] : memref<224x128xbf16, #tpu.memory_space<vmem>>, vector<8x128xbf16>
    tpu.vector_store %arg9[%c181, %c0_31], %54 {strides = array<i32>} : memref<224x128xbf16, #tpu.memory_space<vmem>>, vector<8x128xbf16>,
    %c0_32 = arith.constant 0 : index
    %c0_33 = arith.constant 0 : index
    %56 = vector.load %arg9[%c0_32, %c0_33] : memref<224x128xbf16, #tpu.memory_space<vmem>>, vector<200x128xbf16>
    %c0_34 = arith.constant 0 : index
    %c0_35 = arith.constant 0 : index
    %c0_36 = arith.constant 0 : index
    %57 = vector.load %arg7[%c0_34, %c0_35, %c0_36] : memref<9x128x128xbf16, #tpu.memory_space<vmem>>, vector<1x128x128xbf16>
    %58 = vector.shape_cast %57 : vector<1x128x128xbf16> to vector<128x128xbf16>
    %cst_37 = arith.constant dense<0.000000e+00> : vector<200x128xf32>
    %59 = tpu.matmul %56, %58, %cst_37 {dimension_numbers = #tpu.dot_dimension_numbers<[1], [0], [0], [1], [0, 0, 1, 1], [], []>} : vector<200x128xbf16>, vector<128x128xbf16>, vector<200x128xf32> -> vector<200x128xf32>
    %c1 = arith.constant 1 : index
    %c0_38 = arith.constant 0 : index
    %60 = vector.load %arg9[%c1, %c0_38] : memref<224x128xbf16, #tpu.memory_space<vmem>>, vector<200x128xbf16>
    %c1_39 = arith.constant 1 : index
    %c0_40 = arith.constant 0 : index
    %c0_41 = arith.constant 0 : index
    %61 = vector.load %arg7[%c1_39, %c0_40, %c0_41] : memref<9x128x128xbf16, #tpu.memory_space<vmem>>, vector<1x128x128xbf16>
    %62 = vector.shape_cast %61 : vector<1x128x128xbf16> to vector<128x128xbf16>
    %cst_42 = arith.constant dense<0.000000e+00> : vector<200x128xf32>
    %63 = tpu.matmul %60, %62, %cst_42 {dimension_numbers = #tpu.dot_dimension_numbers<[1], [0], [0], [1], [0, 0, 1, 1], [], []>} : vector<200x128xbf16>, vector<128x128xbf16>, vector<200x128xf32> -> vector<200x128xf32>
    %64 = arith.addf %59, %63 : vector<200x128xf32>
    %c2 = arith.constant 2 : index
    %c0_43 = arith.constant 0 : index
    %65 = vector.load %arg9[%c2, %c0_43] : memref<224x128xbf16, #tpu.memory_space<vmem>>, vector<200x128xbf16>
    %c2_44 = arith.constant 2 : index
    %c0_45 = arith.constant 0 : index
    %c0_46 = arith.constant 0 : index
    %66 = vector.load %arg7[%c2_44, %c0_45, %c0_46] : memref<9x128x128xbf16, #tpu.memory_space<vmem>>, vector<1x128x128xbf16>
    %67 = vector.shape_cast %66 : vector<1x128x128xbf16> to vector<128x128xbf16>
    %cst_47 = arith.constant dense<0.000000e+00> : vector<200x128xf32>
    %68 = tpu.matmul %65, %67, %cst_47 {dimension_numbers = #tpu.dot_dimension_numbers<[1], [0], [0], [1], [0, 0, 1, 1], [], []>} : vector<200x128xbf16>, vector<128x128xbf16>, vector<200x128xf32> -> vector<200x128xf32>
    %69 = arith.addf %64, %68 : vector<200x128xf32>
    %c10 = arith.constant 10 : index
    %c0_48 = arith.constant 0 : index
    %70 = vector.load %arg9[%c10, %c0_48] : memref<224x128xbf16, #tpu.memory_space<vmem>>, vector<200x128xbf16>
    %c3 = arith.constant 3 : index
    %c0_49 = arith.constant 0 : index
    %c0_50 = arith.constant 0 : index
    %71 = vector.load %arg7[%c3, %c0_49, %c0_50] : memref<9x128x128xbf16, #tpu.memory_space<vmem>>, vector<1x128x128xbf16>
    %72 = vector.shape_cast %71 : vector<1x128x128xbf16> to vector<128x128xbf16>
    %cst_51 = arith.constant dense<0.000000e+00> : vector<200x128xf32>
    %73 = tpu.matmul %70, %72, %cst_51 {dimension_numbers = #tpu.dot_dimension_numbers<[1], [0], [0], [1], [0, 0, 1, 1], [], []>} : vector<200x128xbf16>, vector<128x128xbf16>, vector<200x128xf32> -> vector<200x128xf32>
    %74 = arith.addf %69, %73 : vector<200x128xf32>
    %c11_52 = arith.constant 11 : index
    %c0_53 = arith.constant 0 : index
    %75 = vector.load %arg9[%c11_52, %c0_53] : memref<224x128xbf16, #tpu.memory_space<vmem>>, vector<200x128xbf16>
    %c4 = arith.constant 4 : index
    %c0_54 = arith.constant 0 : index
    %c0_55 = arith.constant 0 : index
    %76 = vector.load %arg7[%c4, %c0_54, %c0_55] : memref<9x128x128xbf16, #tpu.memory_space<vmem>>, vector<1x128x128xbf16>
    %77 = vector.shape_cast %76 : vector<1x128x128xbf16> to vector<128x128xbf16>
    %cst_56 = arith.constant dense<0.000000e+00> : vector<200x128xf32>
    %78 = tpu.matmul %75, %77, %cst_56 {dimension_numbers = #tpu.dot_dimension_numbers<[1], [0], [0], [1], [0, 0, 1, 1], [], []>} : vector<200x128xbf16>, vector<128x128xbf16>, vector<200x128xf32> -> vector<200x128xf32>
    %79 = arith.addf %74, %78 : vector<200x128xf32>
    %c12 = arith.constant 12 : index
    %c0_57 = arith.constant 0 : index
    %80 = vector.load %arg9[%c12, %c0_57] : memref<224x128xbf16, #tpu.memory_space<vmem>>, vector<200x128xbf16>
    %c5 = arith.constant 5 : index
    %c0_58 = arith.constant 0 : index
    %c0_59 = arith.constant 0 : index
    %81 = vector.load %arg7[%c5, %c0_58, %c0_59] : memref<9x128x128xbf16, #tpu.memory_space<vmem>>, vector<1x128x128xbf16>
    %82 = vector.shape_cast %81 : vector<1x128x128xbf16> to vector<128x128xbf16>
    %cst_60 = arith.constant dense<0.000000e+00> : vector<200x128xf32>
    %83 = tpu.matmul %80, %82, %cst_60 {dimension_numbers = #tpu.dot_dimension_numbers<[1], [0], [0], [1], [0, 0, 1, 1], [], []>} : vector<200x128xbf16>, vector<128x128xbf16>, vector<200x128xf32> -> vector<200x128xf32>
    %84 = arith.addf %79, %83 : vector<200x128xf32>
    %c20 = arith.constant 20 : index
    %c0_61 = arith.constant 0 : index
    %85 = vector.load %arg9[%c20, %c0_61] : memref<224x128xbf16, #tpu.memory_space<vmem>>, vector<200x128xbf16>
    %c6 = arith.constant 6 : index
    %c0_62 = arith.constant 0 : index
    %c0_63 = arith.constant 0 : index
    %86 = vector.load %arg7[%c6, %c0_62, %c0_63] : memref<9x128x128xbf16, #tpu.memory_space<vmem>>, vector<1x128x128xbf16>
    %87 = vector.shape_cast %86 : vector<1x128x128xbf16> to vector<128x128xbf16>
    %cst_64 = arith.constant dense<0.000000e+00> : vector<200x128xf32>
    %88 = tpu.matmul %85, %87, %cst_64 {dimension_numbers = #tpu.dot_dimension_numbers<[1], [0], [0], [1], [0, 0, 1, 1], [], []>} : vector<200x128xbf16>, vector<128x128xbf16>, vector<200x128xf32> -> vector<200x128xf32>
    %89 = arith.addf %84, %88 : vector<200x128xf32>
    %c21_65 = arith.constant 21 : index
    %c0_66 = arith.constant 0 : index
    %90 = vector.load %arg9[%c21_65, %c0_66] : memref<224x128xbf16, #tpu.memory_space<vmem>>, vector<200x128xbf16>
    %c7 = arith.constant 7 : index
    %c0_67 = arith.constant 0 : index
    %c0_68 = arith.constant 0 : index
    %91 = vector.load %arg7[%c7, %c0_67, %c0_68] : memref<9x128x128xbf16, #tpu.memory_space<vmem>>, vector<1x128x128xbf16>
    %92 = vector.shape_cast %91 : vector<1x128x128xbf16> to vector<128x128xbf16>
    %cst_69 = arith.constant dense<0.000000e+00> : vector<200x128xf32>
    %93 = tpu.matmul %90, %92, %cst_69 {dimension_numbers = #tpu.dot_dimension_numbers<[1], [0], [0], [1], [0, 0, 1, 1], [], []>} : vector<200x128xbf16>, vector<128x128xbf16>, vector<200x128xf32> -> vector<200x128xf32>
    %94 = arith.addf %89, %93 : vector<200x128xf32>
    %c22 = arith.constant 22 : index
    %c0_70 = arith.constant 0 : index
    %95 = vector.load %arg9[%c22, %c0_70] : memref<224x128xbf16, #tpu.memory_space<vmem>>, vector<200x128xbf16>
    %c8 = arith.constant 8 : index
    %c0_71 = arith.constant 0 : index
    %c0_72 = arith.constant 0 : index
    %96 = vector.load %arg7[%c8, %c0_71, %c0_72] : memref<9x128x128xbf16, #tpu.memory_space<vmem>>, vector<1x128x128xbf16>
    %97 = vector.shape_cast %96 : vector<1x128x128xbf16> to vector<128x128xbf16>
    %cst_73 = arith.constant dense<0.000000e+00> : vector<200x128xf32>
    %98 = tpu.matmul %95, %97, %cst_73 {dimension_numbers = #tpu.dot_dimension_numbers<[1], [0], [0], [1], [0, 0, 1, 1], [], []>} : vector<200x128xbf16>, vector<128x128xbf16>, vector<200x128xf32> -> vector<200x128xf32>
    %99 = arith.addf %94, %98 : vector<200x128xf32>
    %100 = arith.truncf %99 : vector<200x128xf32> to vector<200x128xbf16>
    %c0_74 = arith.constant 0 : index
    %c0_75 = arith.constant 0 : index
    %c0_76 = arith.constant 0 : index
    %101 = vector.load %arg8[%c0_74, %c0_75, %c0_76] : memref<1x200x128xbf16, #tpu.memory_space<vmem>>, vector<1x200x128xbf16>
    %102 = vector.shape_cast %101 : vector<1x200x128xbf16> to vector<200x128xbf16>
    %103 = vector.shape_cast %100 : vector<200x128xbf16> to vector<1x200x128xbf16>
    tpu.vector_store %arg8[%c0_74, %c0_75, %c0_76], %103 {strides = array<i32>} : memref<1x200x128xbf16, #tpu.memory_space<vmem>>, vector<1x200x128xbf16>,
    return
  }
  func.func @transform_0(%arg0: i32) -> (i32, i32) {
    %c0_i32 = arith.constant 0 : i32
    %c0_i32_0 = arith.constant 0 : i32
    return %arg0, %c0_i32 : i32, i32
  }
  func.func @transform_1(%arg0: i32) -> (i32, i32) {
    %c0_i32 = arith.constant 0 : i32
    %c0_i32_0 = arith.constant 0 : i32
    %c0_i32_1 = arith.constant 0 : i32
    return %c0_i32, %c0_i32_0 : i32, i32
  }
  func.func @transform_2(%arg0: i32) -> (i32, i32) {
    %c0_i32 = arith.constant 0 : i32
    %c0_i32_0 = arith.constant 0 : i32
    %c0_i32_1 = arith.constant 0 : i32
    return %c0_i32, %c0_i32_0 : i32, i32
  }
  func.func @transform_3(%arg0: i32) -> (i32, i32) {
    %c0_i32 = arith.constant 0 : i32
    %c0_i32_0 = arith.constant 0 : i32
    %c0_i32_1 = arith.constant 0 : i32
    return %c0_i32, %c0_i32_0 : i32, i32
  }
  func.func @transform_4(%arg0: i32) -> (i32, i32) {
    %c0_i32 = arith.constant 0 : i32
    %c0_i32_0 = arith.constant 0 : i32
    %c0_i32_1 = arith.constant 0 : i32
    return %c0_i32, %c0_i32_0 : i32, i32
  }
  func.func @transform_5(%arg0: i32) -> (i32, i32) {
    %c0_i32 = arith.constant 0 : i32
    %c0_i32_0 = arith.constant 0 : i32
    %c0_i32_1 = arith.constant 0 : i32
    return %c0_i32, %c0_i32_0 : i32, i32
  }
  func.func @transform_6(%arg0: i32) -> (i32, i32, i32) {
    %c0_i32 = arith.constant 0 : i32
    %c0_i32_0 = arith.constant 0 : i32
    %c0_i32_1 = arith.constant 0 : i32
    %c0_i32_2 = arith.constant 0 : i32
    return %c0_i32, %c0_i32_0, %c0_i32_1 : i32, i32, i32
  }
  func.func @transform_7(%arg0: i32) -> (i32, i32, i32) {
    %c0_i32 = arith.constant 0 : i32
    %c0_i32_0 = arith.constant 0 : i32
    %c0_i32_1 = arith.constant 0 : i32
    return %arg0, %c0_i32, %c0_i32_0 : i32, i32, i32
  }
}

</mosaic_0001>

<bundles_post_ra>
// kernel: tpu_custom_call.1
= control target key start
LH: loop header
LB: loop body
LE: loop exit
PB: predicated region body
PF: predicated region fallthrough
CT: control target
= control target key end

     0   :  { %12 = vsyncpa [#allocation4], 0  ;;  %s6081_s0 = inlined_call_operand.vmem [shape: bf16[128,64], index: 0, kind: input, shape index: {}]   ;;  %s6082_s1 = inlined_call_operand.vmem [shape: f32[1,64], index: 1, kind: input, shape index: {}]   ;;  %s6083_s2 = inlined_call_operand.vmem [shape: f32[1,64], index: 2, kind: input, shape index: {}]   ;;  %s6084_s3 = inlined_call_operand.vmem [shape: bf16[64,128], index: 3, kind: input, shape index: {}]   ;;  %s6085_s4 = inlined_call_operand.vmem [shape: f32[1,128], index: 4, kind: input, shape index: {}]   ;;  %s6086_s5 = inlined_call_operand.vmem [shape: f32[1,128], index: 5, kind: input, shape index: {}]   ;;  %s6087_s6 = inlined_call_operand.hbm [shape: bf16[9,128,128], index: 6, kind: input, shape index: {}]   ;;  %s6088_s7 = inlined_call_operand.hbm [shape: bf16[1,200,128], index: 7, kind: output, shape index: {}]  }
   0x1   :  { %13 = vsyncpa [#allocation5], 0  ;;  %s4955_s24 = smov [#allocation3]   ;;  %s4907_s28 = scalar_lea.hbm %s6087_s6, 9216 }
   0x2   :  { %s31_s25 = sshll.u32 %s4955_s24, 4  ;;  %p4908_p0 = scmp.ne.s32.totalorder %s6087_s6, %s4907_s28  ;;  %s32_s25 = int_to_ptr.vmem [resolvable:$true] %s31_s25 }
   0x3   :  { %p4911_p1 = scmp.lt.u32.totalorder %s4907_s28, %s6087_s6 }
   0x5   :  { %p4913_p2 = pnand %p4911_p1, %p4908_p0 }
   0x7   :  { %4916 = shalt.err (!%p4913_p2)
}
   0x8   :  { %s4917_s10 = scalar_lea.vmem %s32_s25, 9216  ;;  %p4922_p4 = scmp.lt.s32.totalorder %s32_s25, %s32_s25 }
   0x9   :  { %p4918_p3 = scmp.ne.s32.totalorder %s32_s25, %s4917_s10  ;;  %p4923_p5 = scmp.lt.s32.totalorder %s4917_s10, %s4917_s10 }
   0xb   :  { %p4924_p6 = por %p4923_p5, %p4922_p4 }
   0xd   :  { %p4925_p7 = pnand %p4924_p6, %p4918_p3 }
   0xf   :  { %4928 = shalt.err (!%p4925_p7)
}
  0x10   :  { %s4956_s11 = smov 64   ;;  %s4957_s12 = smov 4  }
  0x11   :  { %37 = dma.hbm_to_vmem [thread:$0]  %s6087_s6, 9216, %s32_s25, [#allocation4], %s4956_s11, %s4956_s11, %s4957_s12  }
  0x12   :  { %4951 = dma.done.wait [#allocation4], 9216  }
  0x13   :  { %4952 = vsyncadd [#allocation4], 4294958080  ;;  %v4811_v0 = vld [vmem:[%s6084_s3] sm:$0xff]   ;;  %v4812_v1 = vld [vmem:[%s6084_s3 + $0x8] sm:$0xff]   ;;  %vm190_vm0 = vcmask 523264   ;;  %vm6089_vm1 = vmmov 0  }
  0x14   :  { %3763 = vmatprep.subr.bf16.mxu0 %v4811_v0  ;;  %v4813_v2 = vld [vmem:[%s6084_s3 + $0x10] sm:$0xff]   ;;  %v3453_v3 = vld [vmem:[%s6081_s0] sm:$0xff]   ;;  %v3544_v7 = vld [vmem:[%s6081_s0 + $0x8] sm:$0xff]   ;;  %vm422_vm2 = vcmask 1047559   ;;  %vm423_vm3 = vsmask.f32 7966 }
  0x15   :  { %3764 = vmatpush3.bf16.msra.mxu0 %v4811_v0  ;;  %v5032_v4 = vld [vmem:[%s6082_s1] ss:$0 sm:$0xff]  ;;  %v3454_v5 = vunpack.c.l.bf16 %v3453_v3  ;;  %v3455_v6 = vunpack.c.h.bf16 %v3453_v3  ;;  %v3545_v8 = vld [vmem:[%s6081_s0 + $0x10] sm:$0xff]   ;;  %v3546_v9 = vld [vmem:[%s6081_s0 + $0x18] sm:$0xff]   ;;  %v3458_v11 = vunpack.c.l.bf16 %v3544_v7  ;;  %v3459_v12 = vunpack.c.h.bf16 %v3544_v7 }
  0x16   :  { %3765 = vmatprep.subr.bf16.mxu0 %v4812_v1  ;;  %v5046_v10 = vld [vmem:[%s6083_s2] ss:$0 sm:$0xff]  ;;  %v3462_v13 = vunpack.c.l.bf16 %v3545_v8  ;;  %v3463_v14 = vunpack.c.h.bf16 %v3545_v8  ;;  %v4814_v15 = vld [vmem:[%s6084_s3 + $0x18] sm:$0xff]   ;;  %v3466_v18 = vunpack.c.l.bf16 %v3546_v9  ;;  %v3467_v19 = vunpack.c.h.bf16 %v3546_v9  ;;  %v3548_v29 = vld [vmem:[%s6081_s0 + $0x28] sm:$0xff]  }
  0x17   :  { %v95_v16 = vmul.f32 %v3454_v5, %v5032_v4  ;;  %v96_v17 = vmul.f32 %v3455_v6, %v5032_v4  ;;  %v97_v20 = vmul.f32 %v3458_v11, %v5032_v4  ;;  %v98_v21 = vmul.f32 %v3459_v12, %v5032_v4  ;;  %v3547_v24 = vld [vmem:[%s6081_s0 + $0x20] sm:$0xff]   ;;  %v3549_v34 = vld [vmem:[%s6081_s0 + $0x30] sm:$0xff]   ;;  %v3550_v39 = vld [vmem:[%s6081_s0 + $0x38] sm:$0xff]  }
  0x18   :  { %v99_v22 = vmul.f32 %v3462_v13, %v5032_v4  ;;  %v100_v23 = vmul.f32 %v3463_v14, %v5032_v4  ;;  %v101_v27 = vmul.f32 %v3466_v18, %v5032_v4  ;;  %v102_v28 = vmul.f32 %v3467_v19, %v5032_v4  ;;  %vm5163_vm12 = vmand %vm422_vm2, %vm423_vm3 }
  0x19   :  { %3766 = vmatpush3.bf16.msra.mxu0 %v4812_v1  ;;  %v118_v25 = vadd.f32 %v5046_v10, %v95_v16  ;;  %v119_v26 = vadd.f32 %v5046_v10, %v96_v17  ;;  %v120_v30 = vadd.f32 %v5046_v10, %v97_v20  ;;  %v121_v31 = vadd.f32 %v5046_v10, %v98_v21 }
  0x1a   :  { %3767 = vmatprep.subr.bf16.mxu0 %v4813_v2  ;;  %v122_v32 = vadd.f32 %v5046_v10, %v99_v22  ;;  %v123_v33 = vadd.f32 %v5046_v10, %v100_v23  ;;  %v124_v37 = vadd.f32 %v5046_v10, %v101_v27  ;;  %v125_v38 = vadd.f32 %v5046_v10, %v102_v28  ;;  %v4818_v27 = vld [vmem:[#allocation3 + $0x58] sm:$0xff]   ;;  %v4819_v28 = vld [vmem:[#allocation3 + $0x100] sm:$0xff]  }
  0x1b   :  { %v134_v35 = vmax.f32 %v118_v25, 0.0  ;;  %v135_v36 = vmax.f32 %v119_v26, 0.0  ;;  %v136_v40 = vmax.f32 %v120_v30, 0.0  ;;  %v137_v41 = vmax.f32 %v121_v31, 0.0  ;;  %v4817_v26 = vld [vmem:[#allocation3 + $0x50] sm:$0xff]   ;;  %v4821_v30 = vld [vmem:[#allocation3 + $0x108] sm:$0xff]  }
  0x1c   :  { %v138_v42 = vmax.f32 %v122_v32, 0.0  ;;  %v139_v43 = vmax.f32 %v123_v33, 0.0  ;;  %v140_v45 = vmax.f32 %v124_v37, 0.0  ;;  %v141_v46 = vmax.f32 %v125_v38, 0.0  ;;  %v4822_v31 = vld [vmem:[#allocation3 + $0x68] sm:$0xff]   ;;  %v4823_v32 = vld [vmem:[#allocation3 + $0x110] sm:$0xff]  }
  0x1d   :  { %3768 = vmatpush3.bf16.msra.mxu0 %v4813_v2  ;;  %v150_v44 = vpack.c.bf16 %v135_v36, %v134_v35  ;;  %v3470_v47 = vunpack.c.l.bf16 %v3547_v24  ;;  %v151_v48 = vpack.c.bf16 %v137_v41, %v136_v40  ;;  %v3471_v49 = vunpack.c.h.bf16 %v3547_v24  ;;  %v4816_v24 = vld [vmem:[#allocation3 + $0x48] sm:$0xff]   ;;  %v4824_v33 = vld [vmem:[#allocation3 + $0x70] sm:$0xff]   ;;  %v4826_v35 = vld [vmem:[#allocation3 + $0x78] sm:$0xff]  }
  0x1e   :  { %3769 = vmatprep.subr.bf16.mxu0 %v4814_v15  ;;  %v3474_v50 = vunpack.c.l.bf16 %v3548_v29  ;;  %v152_v51 = vpack.c.bf16 %v139_v43, %v138_v42  ;;  %v3475_v53 = vunpack.c.h.bf16 %v3548_v29  ;;  %v3478_v54 = vunpack.c.l.bf16 %v3549_v34  ;;  %v4820_v29 = vld [vmem:[#allocation3 + $0x60] sm:$0xff]   ;;  %v4828_v37 = vld [vmem:[#allocation3 + $0x128] sm:$0xff]   ;;  %v4829_v38 = vld [vmem:[#allocation3 + $0x130] sm:$0xff]  }
  0x1f   :  { %3771 = vmatprep.mubr.msk.bf16.mxu0 %vm190_vm0, %v150_v44  ;;  %v103_v52 = vmul.f32 %v3470_v47, %v5032_v4  ;;  %v104_v55 = vmul.f32 %v3471_v49, %v5032_v4  ;;  %v3479_v57 = vunpack.c.h.bf16 %v3549_v34  ;;  %v3482_v58 = vunpack.c.l.bf16 %v3550_v39  ;;  %v4825_v34 = vld [vmem:[#allocation3 + $0x118] sm:$0xff]   ;;  %v4827_v36 = vld [vmem:[#allocation3 + $0x120] sm:$0xff]   ;;  %v5142_v40 = vld [vmem:[%s6085_s4] ss:$0 sm:$0xff]  ;;  %s4961_s4 = smov [#allocation6]  }
  0x20   :  { %v105_v56 = vmul.f32 %v3474_v50, %v5032_v4  ;;  %v106_v60 = vmul.f32 %v3475_v53, %v5032_v4  ;;  %v107_v61 = vmul.f32 %v3478_v54, %v5032_v4  ;;  %v3483_v62 = vunpack.c.h.bf16 %v3550_v39  ;;  %v4830_v39 = vld [vmem:[#allocation3 + $0x138] sm:$0xff]   ;;  %v5149_v44 = vld [vmem:[%s6086_s5] ss:$0 sm:$0xff]  ;;  %s3302_s5 = sshll.u32 %s4961_s4, 4  ;;  %s3303_s5 = int_to_ptr.vmem [resolvable:$true] %s3302_s5 }
  0x21   :  { %3770 = vmatpush3.bf16.msra.mxu0 %v4814_v15  ;;  %v126_v59 = vadd.f32 %v5046_v10, %v103_v52  ;;  %v127_v63 = vadd.f32 %v5046_v10, %v104_v55  ;;  %v108_v1 = vmul.f32 %v3479_v57, %v5032_v4  ;;  %v109_v2 = vmul.f32 %v3482_v58, %v5032_v4  ;;  %s4929_s21 = scalar_lea.vmem %s3303_s5, 1600  ;;  %p4934_p9 = scmp.lt.s32.totalorder %s3303_s5, %s3303_s5 }
  0x22   :  { %v128_v0 = vadd.f32 %v5046_v10, %v105_v56  ;;  %v129_v5 = vadd.f32 %v5046_v10, %v106_v60  ;;  %v130_v6 = vadd.f32 %v5046_v10, %v107_v61  ;;  %v110_v7 = vmul.f32 %v3483_v62, %v5032_v4  ;;  %p4930_p8 = scmp.ne.s32.totalorder %s3303_s5, %s4929_s21  ;;  %p4935_p10 = scmp.lt.s32.totalorder %s4929_s21, %s4929_s21 }
  0x23   :  { %v142_v3 = vmax.f32 %v126_v59, 0.0  ;;  %v143_v8 = vmax.f32 %v127_v63, 0.0  ;;  %v131_v9 = vadd.f32 %v5046_v10, %v108_v1  ;;  %v132_v11 = vadd.f32 %v5046_v10, %v109_v2 }
  0x24   :  { %3772 = vmatmul.mubr.msk.bf16.vlgmr.msra.gmra.mrb[0].mxu0 %vm190_vm0, %v151_v48  ;;  %v144_v12 = vmax.f32 %v128_v0, 0.0  ;;  %v145_v13 = vmax.f32 %v129_v5, 0.0  ;;  %v133_v14 = vadd.f32 %v5046_v10, %v110_v7  ;;  %v153_v15 = vpack.c.bf16 %v141_v46, %v140_v45  ;;  %v4815_v10 = vld [vmem:[#allocation3 + $0x40] sm:$0xff]   ;;  %p4936_p11 = por %p4935_p10, %p4934_p9 }
  0x25   :  { %3775 = vmatprep.mubr.msk.bf16.mxu0 %vm190_vm0, %v152_v51  ;;  %v146_v16 = vmax.f32 %v130_v6, 0.0  ;;  %v147_v17 = vmax.f32 %v131_v9, 0.0  ;;  %v154_v18 = vpack.c.bf16 %v143_v8, %v142_v3  ;;  %v148_v19 = vmax.f32 %v132_v11, 0.0 }
  0x26   :  { %v149_v20 = vmax.f32 %v133_v14, 0.0  ;;  %v155_v4 = vpack.c.bf16 %v145_v13, %v144_v12  ;;  %v4958_v23 = vmov 0.0   ;;  %v4959_v25 = vmov 0   ;;  %p4937_p12 = pnand %p4936_p11, %p4930_p8 }
  0x27   :  { %v156_v21 = vpack.c.bf16 %v147_v17, %v146_v16  ;;  %3787 = vmatprep.subr.bf16.mxu0 %v4958_v23  ;;  %4399 = vmatprep.subr.bf16.mxu1 %v4958_v23  ;;  %43 = vst [vmem:[#allocation2 + $0x8] sm:$0xff] %v4959_v25  ;;  %44 = vst [vmem:[#allocation2 + $0x10] sm:$0xff] %v4959_v25  ;;  %v2669_v41 = vrot.slane %v4959_v25, 2  ;;  %v2670_v42 = vrot.slane %v4959_v25, 3  ;;  %vm444_vm4 = vcmask 1040384  }
  0x28   :  { %v157_v22 = vpack.c.bf16 %v149_v20, %v148_v19  ;;  %3788 = vmatpush3.bf16.msra.mxu0 %v4815_v10  ;;  %45 = vst [vmem:[#allocation2 + $0x18] sm:$0xff] %v4959_v25  ;;  %42 = vst [vmem:[#allocation2] sm:$0xff] %v4959_v25  ;;  %4407 = vmatpush3.bf16.msra.mxu1 %v4819_v28  ;;  %vm428_vm5 = vcmask 1043456   ;;  %vm429_vm6 = vsmask.f32 3328  ;;  %vm438_vm8 = vcmask 1047556  }
  0x29   :  { %3789 = vmatprep.subr.bf16.mxu0 %v4958_v23  ;;  %46 = vst [vmem:[#allocation2 + $0x20] sm:$0xff] %v4959_v25  ;;  %47 = vst [vmem:[#allocation2 + $0x28] sm:$0xff] %v4959_v25  ;;  %4400 = vmatprep.subr.bf16.mxu1 %v4958_v23  ;;  %v5152_v47 = vor.u32 %v2670_v42, %v2669_v41  ;;  %vm445_vm7 = vsmask.f32 256  ;;  %vm439_vm9 = vsmask.f32 7954 }
  0x2a   :  { %48 = vst [vmem:[#allocation2 + $0x30] sm:$0xff] %v4959_v25  ;;  %49 = vst [vmem:[#allocation2 + $0x38] sm:$0xff] %v4959_v25  ;;  %4095 = vmatprep.mubr.msk.bf16.mxu1 %vm6089_vm1, %v4958_v23  ;;  %vm391_vm10 = vcmask 1047557   ;;  %vm6091_vm11 = vcmask 1041408   ;;  %vm392_vm13 = vsmask.f32 7958 }
  0x2b   :  { %50 = vst [vmem:[#allocation2 + $0x40] sm:$0xff] %v4959_v25  ;;  %51 = vst [vmem:[#allocation2 + $0x48] sm:$0xff] %v4959_v25  ;;  %vm398_vm14 = vsmask.f32 1280 }
  0x2c   :  { %3776 = vmatmul.mubr.msk.bf16.gmra.mrb[4].mxu0 %vm190_vm0, %v153_v15  ;;  %52 = vst [vmem:[#allocation2 + $0x50] sm:$0xff] %v4959_v25  ;;  %53 = vst [vmem:[#allocation2 + $0x58] sm:$0xff] %v4959_v25  ;;  %4408 = vmatpush3.bf16.msra.mxu1 %v4821_v30 }
  0x2d   :  { %3779 = vmatprep.mubr.msk.bf16.mxu0 %vm190_vm0, %v154_v18  ;;  %54 = vst [vmem:[#allocation2 + $0x60] sm:$0xff] %v4959_v25  ;;  %55 = vst [vmem:[#allocation2 + $0x68] sm:$0xff] %v4959_v25  ;;  %3790 = vmatpush3.bf16.msra.mxu0 %v4816_v24 }
  0x2e   :  { %3791 = vmatprep.subr.bf16.mxu0 %v4958_v23  ;;  %4401 = vmatprep.subr.bf16.mxu1 %v4958_v23  ;;  %vm5170_vm15 = vmand %vm444_vm4, %vm445_vm7  ;;  %v425_v9 = vld [vmem:[#allocation2 + $0x8] sm:$0x80]  ;;  %vm491_vm4 = vsmask.f32 7438  ;;  %v431_v15 = vld [vmem:[#allocation2 + $0x10] sm:$0xf] }
  0x2f   :  { %vm5177_vm2 = vmand %vm428_vm5, %vm429_vm6  ;;  %v447_v17 = vld [vmem:[#allocation2 + $0x18] sm:$0x1]  ;;  %vm501_vm6 = vsmask.f32 4354  ;;  %v441_v10 = vld [vmem:[#allocation2 + $0x10] sm:$0xf0] }
  0x30   :  { %4409 = vmatpush3.bf16.msra.mxu1 %v4823_v32  ;;  %vm5185_vm7 = vmand %vm438_vm8, %vm439_vm9  ;;  %vm460_vm9 = vsmask.f32 5382  ;;  %v394_v30 = vld [vmem:[#allocation2] sm:$0xe0]  ;;  %v410_v41 = vld [vmem:[#allocation2 + $0x8] sm:$0x7c] }
  0x31   :  { %3792 = vmatpush3.bf16.msra.mxu0 %v4817_v26  ;;  %4402 = vmatprep.subr.bf16.mxu1 %v4958_v23  ;;  %vm5193_vm3 = vmand %vm391_vm10, %vm392_vm13  ;;  %vm470_vm13 = vsmask.f32 7962 }
  0x32   :  { %3793 = vmatprep.subr.bf16.mxu0 %v4958_v23  ;;  %vm5200_vm5 = vmand %vm6091_vm11, %vm398_vm14  ;;  %vm476_vm14 = vsmask.f32 2304 }
  0x34   :  { %3780 = vmatmul.mubr.msk.bf16.gmra.mrb[8].mxu0 %vm190_vm0, %v155_v4  ;;  %4410 = vmatpush3.bf16.msra.mxu1 %v4825_v34 }
  0x35   :  { %3783 = vmatprep.mubr.msk.bf16.mxu0 %vm190_vm0, %v156_v21  ;;  %3794 = vmatpush3.bf16.msra.mxu0 %v4818_v27 }
  0x36   :  { %3795 = vmatprep.subr.bf16.mxu0 %v4958_v23  ;;  %4403 = vmatprep.subr.bf16.mxu1 %v4958_v23 }
  0x38   :  { %4411 = vmatpush3.bf16.msra.mxu1 %v4827_v36 }
  0x39   :  { %3796 = vmatpush3.bf16.msra.mxu0 %v4820_v29  ;;  %4404 = vmatprep.subr.bf16.mxu1 %v4958_v23 }
  0x3a   :  { %3797 = vmatprep.subr.bf16.mxu0 %v4958_v23 }
  0x3c   :  { %3784 = vmatmul.mubr.msk.bf16.gmra.mrb[12].mxu0 %vm190_vm0, %v157_v22  ;;  %4412 = vmatpush3.bf16.msra.mxu1 %v4828_v37  ;;  %vm407_vm0 = vcmask 1046530  }
  0x3d   :  { %3798 = vmatpush3.bf16.msra.mxu0 %v4822_v31  ;;  %3803 = vmatprep.mubr.msk.bf16.mxu0 %vm6089_vm1, %v4958_v23  ;;  %vm408_vm1 = vsmask.f32 6410  ;;  %v4837_v31 = vld [vmem:[#allocation3 + $0x8] sm:$0xff]  }
  0x3e   :  { %3799 = vmatprep.subr.bf16.mxu0 %v4958_v23  ;;  %4405 = vmatprep.subr.bf16.mxu1 %v4958_v23  ;;  %vm5210_vm8 = vmand %vm407_vm0, %vm408_vm1  ;;  %vm6106_vm0 = vcmask 1047555   ;;  %vm6109_vm1 = vcmask 1044480  }
  0x3f   :  { %vm5234_vm11 = vmand %vm6106_vm0, %vm491_vm4  ;;  %vm6112_vm4 = vcmask 1045505  }
  0x40   :  { %4413 = vmatpush3.bf16.msra.mxu1 %v4829_v38  ;;  %v400_v38 = vld [vmem:[#allocation2 + $0x8] sm:$0x3]  ;;  %vm5240_vm10 = vmand %vm6109_vm1, %vm501_vm6  ;;  %vm6115_vm6 = vcmask 1047558  }
  0x41   :  { %3800 = vmatpush3.bf16.msra.mxu0 %v4824_v33  ;;  %4406 = vmatprep.subr.bf16.mxu1 %v4958_v23  ;;  %vm5246_vm0 = vmand %vm6112_vm4, %vm460_vm9  ;;  %vm6118_vm9 = vcmask 1042432  }
  0x42   :  { %3801 = vmatprep.subr.bf16.mxu0 %v4958_v23  ;;  %vm5253_vm1 = vmand %vm6115_vm6, %vm470_vm13 }
  0x43   :  { %vm5263_vm4 = vmand %vm6118_vm9, %vm476_vm14 }
  0x44   :  { %4414 = vmatpush3.bf16.msra.mxu1 %v4830_v39  ;;  %v569_v39 = vld [vmem:[#allocation2 + $0x50] sm:$0x1f] }
  0x45   :  { %3802 = vmatpush3.bf16.msra.mxu0 %v4826_v35  ;;  %4127 = vmatprep.subr.bf16.mxu1 %v4958_v23 }
  0x46   :  { %3855 = vmatprep.subr.bf16.mxu0 %v4958_v23 }
  0xf7   :  { %v3773_v43 = vpop.f32.mrb[0].mxu0 }
  0xf8   :  { %v321_v45 = vmul.f32 %v3773_v43, %v5142_v40  ;;  %v249_v46 = vpop.f32.mrb[1].mxu0 }
  0xf9   :  { %v319_v48 = vmul.f32 %v5142_v40, %v249_v46  ;;  %v3774_v49 = vpop.f32.mrb[2].mxu0 }
  0xfa   :  { %v344_v50 = vadd.f32 %v5149_v44, %v321_v45  ;;  %v322_v51 = vmul.f32 %v3774_v49, %v5142_v40  ;;  %v252_v52 = vpop.f32.mrb[3].mxu0 }
  0xfb   :  { %v342_v53 = vadd.f32 %v5149_v44, %v319_v48  ;;  %v320_v54 = vmul.f32 %v5142_v40, %v252_v52 }
  0xfc   :  { %v345_v55 = vadd.f32 %v5149_v44, %v322_v51  ;;  %v360_v57 = vmax.f32 %v344_v50, 0.0 }
  0xfd   :  { %v343_v56 = vadd.f32 %v5149_v44, %v320_v54  ;;  %v358_v59 = vmax.f32 %v342_v53, 0.0 }
  0xfe   :  { %v361_v58 = vmax.f32 %v345_v55, 0.0 }
  0xff   :  { %v359_v60 = vmax.f32 %v343_v56, 0.0  ;;  %v3777_v61 = vpop.f32.mrb[4].mxu0 }
 0x100   :  { %v375_v62 = vpack.c.bf16 %v361_v58, %v360_v57  ;;  %v325_v0 = vmul.f32 %v3777_v61, %v5142_v40  ;;  %v265_v1 = vpop.f32.mrb[5].mxu0 }
 0x101   :  { %v374_v3 = vpack.c.bf16 %v359_v60, %v358_v59  ;;  %v323_v5 = vmul.f32 %v5142_v40, %v265_v1  ;;  %v3778_v6 = vpop.f32.mrb[6].mxu0 }
 0x102   :  { %v414_v7 = vshll.u32 %v375_v62, 16  ;;  %v417_v8 = vshrl.u32 %v375_v62, 16  ;;  %v348_v12 = vadd.f32 %v5149_v44, %v325_v0  ;;  %v326_v13 = vmul.f32 %v3778_v6, %v5142_v40  ;;  %v268_v14 = vpop.f32.mrb[7].mxu0 }
 0x103   :  { %v383_v18 = vshrl.u32 %v374_v3, 16  ;;  %v386_v19 = vshll.u32 %v374_v3, 16  ;;  %v346_v20 = vadd.f32 %v5149_v44, %v323_v5  ;;  %v324_v4 = vmul.f32 %v5142_v40, %v268_v14  ;;  %v493_v14 = vld [vmem:[#allocation2 + $0x20] sm:$0xf8] }
 0x104   :  { %v416_v21 = vrot.slane %v414_v7, 1  ;;  %v434_v22 = vrot.slane %v417_v8, 7  ;;  %v364_v26 = vmax.f32 %v348_v12, 0.0  ;;  %v349_v27 = vadd.f32 %v5149_v44, %v326_v13  ;;  %v4839_v13 = vld [vmem:[#allocation3 + $0x10] sm:$0xff]  }
 0x105   :  { %v385_v28 = vrot.slane %v383_v18, 2  ;;  %v388_v29 = vrot.slane %v386_v19, 3  ;;  %v403_v32 = vrot.slane %v383_v18, 1  ;;  %v404_v33 = vrot.slane %v386_v19, 2  ;;  %v503_v19 = vld [vmem:[#allocation2 + $0x28] sm:$0x1f] }
 0x106   :  { %v419_v34 = vor.u32 %v417_v8, %v416_v21  ;;  %v426_v35 = vsel %vm5163_vm12, %v416_v21, %v425_v9  ;;  %v435_v36 = vor.u32 %v434_v22, %v414_v7  ;;  %v448_v37 = vsel %vm5170_vm15, %v434_v22, %v447_v17 }
 0x107   :  { %427 = vst [vmem:[#allocation2 + $0x8] sm:$0x80] %v426_v35  ;;  %449 = vst [vmem:[#allocation2 + $0x18] sm:$0x1] %v448_v37  ;;  %v389_v42 = vor.u32 %v388_v29, %v385_v28  ;;  %v405_v43 = vor.u32 %v404_v33, %v403_v32  ;;  %v362_v45 = vmax.f32 %v346_v20, 0.0  ;;  %v365_v46 = vmax.f32 %v349_v27, 0.0 }
 0x108   :  { %v3781_v48 = vpop.f32.mrb[8].mxu0  ;;  %v432_v49 = vsel %vm5177_vm2, %v419_v34, %v431_v15  ;;  %v442_v50 = vsel %vm5185_vm7, %v435_v36, %v441_v10  ;;  %v347_v51 = vadd.f32 %v5149_v44, %v324_v4  ;;  %v462_v28 = vld [vmem:[#allocation2 + $0x18] sm:$0x3e] }
 0x109   :  { %v329_v52 = vmul.f32 %v3781_v48, %v5142_v40  ;;  %v281_v53 = vpop.f32.mrb[9].mxu0  ;;  %433 = vst [vmem:[#allocation2 + $0x10] sm:$0xf] %v432_v49  ;;  %443 = vst [vmem:[#allocation2 + $0x10] sm:$0xf0] %v442_v50  ;;  %v395_v54 = vsel %vm5193_vm3, %v389_v42, %v394_v30  ;;  %v401_v55 = vsel %vm5200_vm5, %v389_v42, %v400_v38 }
 0x10a   :  { %v411_v56 = vsel %vm5210_vm8, %v405_v43, %v410_v41  ;;  %v377_v57 = vpack.c.bf16 %v365_v46, %v364_v26  ;;  %v3782_v58 = vpop.f32.mrb[10].mxu0  ;;  %396 = vst [vmem:[#allocation2] sm:$0xe0] %v395_v54  ;;  %402 = vst [vmem:[#allocation2 + $0x8] sm:$0x3] %v401_v55  ;;  %v363_v59 = vmax.f32 %v347_v51, 0.0  ;;  %v327_v61 = vmul.f32 %v5142_v40, %v281_v53 }
 0x10b   :  { %412 = vst [vmem:[#allocation2 + $0x8] sm:$0x7c] %v411_v56  ;;  %v352_v60 = vadd.f32 %v5149_v44, %v329_v52  ;;  %v330_v62 = vmul.f32 %v3782_v58, %v5142_v40  ;;  %v284_v0 = vpop.f32.mrb[11].mxu0  ;;  %v472_v43 = vld [vmem:[#allocation2 + $0x18] sm:$0xc0] }
 0x10c   :  { %v482_v1 = vshrl.u32 %v377_v57, 16  ;;  %v485_v3 = vshll.u32 %v377_v57, 16  ;;  %v328_v5 = vmul.f32 %v5142_v40, %v284_v0  ;;  %v376_v6 = vpack.c.bf16 %v363_v59, %v362_v45  ;;  %v478_v46 = vld [vmem:[#allocation2 + $0x20] sm:$0x7] }
 0x10d   :  { %v350_v7 = vadd.f32 %v5149_v44, %v327_v61  ;;  %v353_v8 = vadd.f32 %v5149_v44, %v330_v62  ;;  %v368_v21 = vmax.f32 %v352_v60, 0.0  ;;  %v540_v0 = vld [vmem:[#allocation2 + $0x40] sm:$0x3e] }
 0x10e   :  { %v484_v9 = vrot.slane %v482_v1, 4  ;;  %v487_v12 = vrot.slane %v485_v3, 5  ;;  %v496_v15 = vrot.slane %v482_v1, 3  ;;  %v497_v17 = vrot.slane %v485_v3, 4 }
 0x10f   :  { %v451_v20 = vshrl.u32 %v376_v6, 16  ;;  %v454_v4 = vshll.u32 %v376_v6, 16  ;;  %v369_v22 = vmax.f32 %v353_v8, 0.0  ;;  %v366_v29 = vmax.f32 %v350_v7, 0.0  ;;  %v3785_v32 = vpop.f32.mrb[12].mxu0 }
 0x110   :  { %v488_v10 = vor.u32 %v487_v12, %v484_v9  ;;  %v498_v26 = vor.u32 %v497_v17, %v496_v15  ;;  %v351_v30 = vadd.f32 %v5149_v44, %v328_v5  ;;  %v297_v38 = vpop.f32.mrb[13].mxu0  ;;  %v333_v53 = vmul.f32 %v3785_v32, %v5142_v40  ;;  %v547_v8 = vld [vmem:[#allocation2 + $0x40] sm:$0xc0]  ;;  %v550_v9 = vld [vmem:[#allocation2 + $0x48] sm:$0x7] }
 0x111   :  { %v453_v33 = vrot.slane %v451_v20, 6  ;;  %v456_v34 = vrot.slane %v454_v4, 7  ;;  %v465_v35 = vrot.slane %v451_v20, 5  ;;  %v466_v36 = vrot.slane %v454_v4, 6  ;;  %v3786_v50 = vpop.f32.mrb[14].mxu0 }
 0x112   :  { %v494_v41 = vsel %vm5234_vm11, %v488_v10, %v493_v14  ;;  %v504_v42 = vsel %vm5240_vm10, %v498_v26, %v503_v19  ;;  %v379_v48 = vpack.c.bf16 %v369_v22, %v368_v21  ;;  %v367_v49 = vmax.f32 %v351_v30, 0.0  ;;  %v300_v55 = vpop.f32.mrb[15].mxu0  ;;  %v515_v20 = vld [vmem:[#allocation2 + $0x30] sm:$0x80]  ;;  %v528_v4 = vld [vmem:[#allocation2 + $0x40] sm:$0x1] }
 0x113   :  { %495 = vst [vmem:[#allocation2 + $0x20] sm:$0xf8] %v494_v41  ;;  %505 = vst [vmem:[#allocation2 + $0x28] sm:$0x1f] %v504_v42  ;;  %v457_v51 = vor.u32 %v456_v34, %v453_v33  ;;  %v467_v52 = vor.u32 %v466_v36, %v465_v35  ;;  %v331_v54 = vmul.f32 %v5142_v40, %v297_v38  ;;  %v518_v34 = vld [vmem:[#allocation2 + $0x38] sm:$0xf] }
 0x114   :  { %v532_v56 = vshrl.u32 %v379_v48, 16  ;;  %v535_v57 = vshll.u32 %v379_v48, 16  ;;  %v378_v58 = vpack.c.bf16 %v367_v49, %v366_v29  ;;  %v334_v59 = vmul.f32 %v3786_v50, %v5142_v40  ;;  %v5280_v29 = vld [vmem:[#allocation2] sm:$0xff]  ;;  %v525_v35 = vld [vmem:[#allocation2 + $0x38] sm:$0xf0]  ;;  %v5288_v38 = vld [vmem:[#allocation2 + $0x8] sm:$0xff] }
 0x115   :  { %v463_v60 = vsel %vm5246_vm0, %v457_v51, %v462_v28  ;;  %v473_v61 = vsel %vm5253_vm1, %v467_v52, %v472_v43  ;;  %v479_v62 = vsel %vm5263_vm4, %v467_v52, %v478_v46  ;;  %v356_v1 = vadd.f32 %v5149_v44, %v333_v53  ;;  %v581_v53 = vld [vmem:[#allocation2 + $0x50] sm:$0xe0] }
 0x116   :  { %464 = vst [vmem:[#allocation2 + $0x18] sm:$0x3e] %v463_v60  ;;  %474 = vst [vmem:[#allocation2 + $0x18] sm:$0xc0] %v473_v61  ;;  %v534_v3 = vrot.slane %v532_v56, 6  ;;  %v537_v5 = vrot.slane %v535_v57, 7  ;;  %v357_v21 = vadd.f32 %v5149_v44, %v334_v59  ;;  %v332_v22 = vmul.f32 %v5142_v40, %v300_v55 }
 0x117   :  { %480 = vst [vmem:[#allocation2 + $0x20] sm:$0x7] %v479_v62  ;;  %v543_v6 = vrot.slane %v532_v56, 5  ;;  %v544_v7 = vrot.slane %v535_v57, 6  ;;  %v507_v12 = vshll.u32 %v378_v58, 16  ;;  %v510_v14 = vshrl.u32 %v378_v58, 16 }
 0x118   :  { %v372_v15 = vmax.f32 %v356_v1, 0.0  ;;  %v538_v17 = vor.u32 %v537_v5, %v534_v3  ;;  %v354_v28 = vadd.f32 %v5149_v44, %v331_v54  ;;  %v373_v36 = vmax.f32 %v357_v21, 0.0  ;;  %v584_v56 = vld [vmem:[#allocation2 + $0x58] sm:$0x3]  ;;  %v591_v58 = vld [vmem:[#allocation2 + $0x58] sm:$0x7c] }
 0x119   :  { %v545_v19 = vor.u32 %v544_v7, %v543_v6  ;;  %v509_v10 = vrot.slane %v507_v12, 1  ;;  %v521_v26 = vrot.slane %v510_v14, 7  ;;  %v355_v43 = vadd.f32 %v5149_v44, %v332_v22  ;;  %v5304_v62 = vld [vmem:[#allocation2 + $0x10] sm:$0xff] }
 0x11a   :  { %v541_v30 = vsel %vm5246_vm0, %v538_v17, %v540_v0  ;;  %v381_v42 = vpack.c.bf16 %v373_v36, %v372_v15  ;;  %v645_v45 = vshll.u32 %v5280_v29, 16  ;;  %v370_v49 = vmax.f32 %v354_v28, 0.0  ;;  %v5302_v54 = vld [vmem:[#allocation2 + $0x28] sm:$0xff]  ;;  %v4834_v0 = vld [vmem:[#allocation3] sm:$0xff]  }
 0x11b   :  { %v548_v32 = vsel %vm5253_vm1, %v545_v19, %v547_v8  ;;  %v551_v33 = vsel %vm5263_vm4, %v545_v19, %v550_v9  ;;  %542 = vst [vmem:[#allocation2 + $0x40] sm:$0x3e] %v541_v30  ;;  %v512_v40 = vor.u32 %v510_v14, %v509_v10  ;;  %v516_v41 = vsel %vm5163_vm12, %v509_v10, %v515_v20  ;;  %v562_v20 = vld [vmem:[#allocation2 + $0x48] sm:$0xf8] }
 0x11c   :  { %549 = vst [vmem:[#allocation2 + $0x40] sm:$0xc0] %v548_v32  ;;  %552 = vst [vmem:[#allocation2 + $0x48] sm:$0x7] %v551_v33  ;;  %v522_v27 = vor.u32 %v521_v26, %v507_v12  ;;  %v529_v37 = vsel %vm5170_vm15, %v521_v26, %v528_v4  ;;  %v650_v63 = vshll.u32 %v5288_v38, 16  ;;  %v573_v2 = vshrl.u32 %v381_v42, 16 }
 0x11d   :  { %517 = vst [vmem:[#allocation2 + $0x30] sm:$0x80] %v516_v41  ;;  %530 = vst [vmem:[#allocation2 + $0x40] sm:$0x1] %v529_v37  ;;  %v519_v46 = vsel %vm5177_vm2, %v512_v40, %v518_v34  ;;  %v576_v50 = vshll.u32 %v381_v42, 16  ;;  %v371_v51 = vmax.f32 %v355_v43, 0.0 }
 0x11e   :  { %v526_v48 = vsel %vm5185_vm7, %v522_v27, %v525_v35  ;;  %520 = vst [vmem:[#allocation2 + $0x38] sm:$0xf] %v519_v46  ;;  %v647_v52 = vrot.slane %v645_v45, 1  ;;  %vm641_vm12 = vsmask.f32 7424  ;;  %v643_v44 = vshrl.u32 %v5280_v29, 16 }
 0x11f   :  { %527 = vst [vmem:[#allocation2 + $0x38] sm:$0xf0] %v526_v48  ;;  %v575_v11 = vrot.slane %v573_v2, 2  ;;  %v578_v55 = vrot.slane %v576_v50, 3  ;;  %v587_v16 = vrot.slane %v573_v2, 1  ;;  %v588_v57 = vrot.slane %v576_v50, 2 }
 0x120   :  { %v380_v59 = vpack.c.bf16 %v371_v51, %v370_v49  ;;  %v648_v60 = vor.u32 %v647_v52, %v643_v44  ;;  %v652_v61 = vrot.slane %v650_v63, 1  ;;  %v5307_v5 = vshrl.u32 %v5302_v54, 16  ;;  %v5340_v27 = vld [vmem:[#allocation2 + $0x18] sm:$0xff]  ;;  %v4831_v63 = vld [vmem:[#allocation3 + $0x140] sm:$0xff]  }
 0x121   :  { %v579_v1 = vor.u32 %v578_v55, %v575_v11  ;;  %v589_v3 = vor.u32 %v588_v57, %v587_v16  ;;  %v5310_v6 = vshll.u32 %v5302_v54, 16  ;;  %v654_v12 = vshrl.u32 %v5288_v38, 16  ;;  %v4832_v44 = vld [vmem:[#allocation3 + $0x148] sm:$0xff]  }
 0x122   :  { %v554_v7 = vshrl.u32 %v380_v59, 16  ;;  %v557_v8 = vshll.u32 %v380_v59, 16  ;;  %v653_v9 = vsel %vm641_vm12, %v648_v60, %v652_v61  ;;  %v5323_v4 = vshll.u32 %v5304_v62, 16  ;;  %v5383_v60 = vld [vmem:[#allocation2 + $0x20] sm:$0xff] }
 0x123   :  { %v582_v15 = vsel %vm5193_vm3, %v579_v1, %v581_v53  ;;  %v585_v17 = vsel %vm5200_vm5, %v579_v1, %v584_v56  ;;  %v592_v19 = vsel %vm5210_vm8, %v589_v3, %v591_v58  ;;  %3804 = vmatmul.mubr.bf16.vlgmr.msra.gmra.mrb[16].mxu0 %v653_v9  ;;  %vm6121_vm15 = vmmov 0   ;;  %v4842_v56 = vld [vmem:[#allocation3 + $0x18] sm:$0xff]   ;;  %v4844_v1 = vld [vmem:[#allocation3 + $0x20] sm:$0xff]  }
 0x124   :  { %v5314_v14 = vld [vmem:[#allocation2 + $0x30] sm:$0xff]  ;;  %583 = vst [vmem:[#allocation2 + $0x50] sm:$0xe0] %v582_v15  ;;  %586 = vst [vmem:[#allocation2 + $0x58] sm:$0x3] %v585_v17  ;;  %v556_v21 = vrot.slane %v554_v7, 4  ;;  %3807 = vmatprep.mubr.msk.bf16.mxu0 %vm6121_vm15, %v4958_v23  ;;  %3856 = vmatpush3.bf16.msra.mxu0 %v4834_v0  ;;  %v656_v36 = vor.u32 %v654_v12, %v652_v61 }
 0x125   :  { %593 = vst [vmem:[#allocation2 + $0x58] sm:$0x7c] %v592_v19  ;;  %v559_v22 = vrot.slane %v557_v8, 5  ;;  %v565_v10 = vrot.slane %v554_v7, 3  ;;  %v566_v26 = vrot.slane %v557_v8, 4  ;;  %v1764_v28 = vrot.slane %v5307_v5, 5  ;;  %3857 = vmatprep.subr.bf16.mxu0 %v4958_v23 }
 0x126   :  { %v5327_v24 = vld [vmem:[#allocation2 + $0x38] sm:$0xff]  ;;  %v1767_v30 = vrot.slane %v5310_v6, 6  ;;  %v5332_v32 = vshrl.u32 %v5314_v14, 16  ;;  %v5335_v33 = vshll.u32 %v5314_v14, 16  ;;  %v660_v46 = vrot.slane %v5323_v4, 1  ;;  %v5366_v53 = vld [vmem:[#allocation2 + $0x40] sm:$0xff] }
 0x127   :  { %v560_v34 = vor.u32 %v559_v22, %v556_v21  ;;  %v567_v35 = vor.u32 %v566_v26, %v565_v10  ;;  %v5343_v37 = vshrl.u32 %v5327_v24, 16  ;;  %v5346_v42 = vshll.u32 %v5327_v24, 16  ;;  %v4833_v61 = vld [vmem:[#allocation3 + $0x150] sm:$0xff]   ;;  %v4835_v17 = vld [vmem:[#allocation3 + $0x158] sm:$0xff]  }
 0x128   :  { %v1773_v40 = vrot.slane %v5332_v32, 5  ;;  %v1776_v41 = vrot.slane %v5335_v33, 6  ;;  %3858 = vmatpush3.bf16.msra.mxu0 %v4837_v31  ;;  %v5353_v48 = vor.u32 %v1767_v30, %v1764_v28  ;;  %v661_v2 = vsel %vm641_vm12, %v656_v36, %v660_v46  ;;  %v4836_v31 = vld [vmem:[#allocation3 + $0x160] sm:$0xff]   ;;  %v4847_v28 = vld [vmem:[#allocation3 + $0x30] sm:$0xff]  }
 0x129   :  { %v563_v43 = vsel %vm5234_vm11, %v560_v34, %v562_v20  ;;  %v570_v45 = vsel %vm5240_vm10, %v567_v35, %v569_v39  ;;  %3859 = vmatprep.subr.bf16.mxu0 %v4958_v23  ;;  %v5358_v50 = vshll.u32 %v5340_v27, 16  ;;  %v1782_v51 = vrot.slane %v5343_v37, 5  ;;  %v4846_v20 = vld [vmem:[#allocation3 + $0x28] sm:$0xff]  }
 0x12a   :  { %564 = vst [vmem:[#allocation2 + $0x48] sm:$0xf8] %v563_v43  ;;  %571 = vst [vmem:[#allocation2 + $0x50] sm:$0x1f] %v570_v45  ;;  %v1777_v49 = vor.u32 %v1776_v41, %v1773_v40  ;;  %v1785_v52 = vrot.slane %v5346_v42, 6  ;;  %v5371_v11 = vshrl.u32 %v5304_v62, 16 }
 0x12b   :  { %3808 = vmatmul.mubr.bf16.gmra.mrb[20].mxu0 %v661_v2  ;;  %v668_v55 = vrot.slane %v5358_v50, 1  ;;  %v5376_v57 = vshrl.u32 %v5366_v53, 16  ;;  %v5379_v58 = vshll.u32 %v5366_v53, 16  ;;  %v5394_v9 = vshrl.u32 %v5340_v27, 16  ;;  %v4838_v41 = vld [vmem:[#allocation3 + $0x168] sm:$0xff]   ;;  %v4848_v45 = vld [vmem:[#allocation3 + $0x38] sm:$0xff]  }
 0x12c   :  { %v1778_v18 = vsel %vm476_vm14, %v5353_v48, %v1777_v49  ;;  %3811 = vmatprep.mubr.msk.bf16.mxu0 %vm6121_vm15, %v4958_v23  ;;  %3860 = vmatpush3.bf16.msra.mxu0 %v4839_v13  ;;  %v1786_v16 = vor.u32 %v1785_v52, %v1782_v51  ;;  %v664_v59 = vor.u32 %v5371_v11, %v660_v46  ;;  %v5397_v12 = vshll.u32 %v5383_v60, 16  ;;  %v4840_v13 = vld [vmem:[#allocation3 + $0x170] sm:$0xff]  }
 0x12d   :  { %4096 = vmatmul.mubr.bf16.vlgmr.msra.gmra.mrb[0].mxu1 %v1778_v18  ;;  %3861 = vmatprep.subr.bf16.mxu0 %v4958_v23  ;;  %v1791_v7 = vrot.slane %v5376_v57, 5  ;;  %v1794_v8 = vrot.slane %v5379_v58, 6  ;;  %v672_v19 = vor.u32 %v5394_v9, %v668_v55  ;;  %v5422_v36 = vshrl.u32 %v5383_v60, 16 }
 0x12e   :  { %4128 = vmatpush3.bf16.msra.mxu1 %v4831_v63  ;;  %4099 = vmatprep.mubr.msk.bf16.mxu1 %vm6121_vm15, %v4958_v23  ;;  %v669_v0 = vsel %vm641_vm12, %v664_v59, %v668_v55  ;;  %v1787_v3 = vsel %vm476_vm14, %v1777_v49, %v1786_v16  ;;  %v676_v26 = vrot.slane %v5397_v12, 1  ;;  %v684_v2 = vrot.slane %v5310_v6, 1  ;;  %v5446_v55 = vld [vmem:[#allocation2 + $0x60] sm:$0x1f]  ;;  %v5451_v59 = vld [vmem:[#allocation2 + $0x58] sm:$0xff] }
 0x12f   :  { %4129 = vmatprep.subr.bf16.mxu1 %v4958_v23  ;;  %v1795_v21 = vor.u32 %v1794_v8, %v1791_v7  ;;  %v5460_v7 = vshll.u32 %v5451_v59, 16  ;;  %v1179_v8 = vrot.slane %v5451_v59, 1  ;;  %vm1157_vm11 = vcmask 1046528  }
 0x130   :  { %3862 = vmatpush3.bf16.msra.mxu0 %v4842_v56  ;;  %v677_v39 = vsel %vm641_vm12, %v672_v19, %v676_v26  ;;  %v680_v43 = vor.u32 %v5422_v36, %v676_v26  ;;  %v4841_v56 = vld [vmem:[#allocation3 + $0x178] sm:$0xff]   ;;  %vm2620_vm2 = vsmask.f32 5376  ;;  %vm6122_vm3 = vcmask 1041408  }
 0x131   :  { %3863 = vmatprep.subr.bf16.mxu0 %v4958_v23  ;;  %v5399_v15 = vld [vmem:[#allocation2 + $0x48] sm:$0xff]  ;;  %v1796_v30 = vsel %vm476_vm14, %v1786_v16, %v1795_v21  ;;  %v5424_v40 = vld [vmem:[#allocation2 + $0x50] sm:$0xff]  ;;  %v692_v16 = vrot.slane %v5335_v33, 1  ;;  %vm6123_vm7 = vmmov %vm6122_vm3 }
 0x132   :  { %4130 = vmatpush3.bf16.msra.mxu1 %v4832_v44  ;;  %v5406_v22 = vshrl.u32 %v5399_v15, 16  ;;  %v5409_v10 = vshll.u32 %v5399_v15, 16  ;;  %v5431_v49 = vshrl.u32 %v5424_v40, 16  ;;  %v5434_v63 = vshll.u32 %v5424_v40, 16  ;;  %vm6124_vm5 = vmmov %vm6122_vm3 }
 0x133   :  { %4131 = vmatprep.subr.bf16.mxu1 %v4958_v23  ;;  %3812 = vmatmul.mubr.bf16.gmra.mrb[24].mxu0 %v669_v0  ;;  %v685_v18 = vsel %vm641_vm12, %v680_v43, %v684_v2  ;;  %v5455_v0 = vshrl.u32 %v5451_v59, 16  ;;  %v2646_v43 = vrot.slane %v5335_v33, 3  ;;  %v1830_v33 = vrot.slane %v4959_v25, 6  ;;  %vm6125_vm8 = vmmov %vm6122_vm3 }
 0x134   :  { %3815 = vmatprep.mubr.msk.bf16.mxu0 %vm6121_vm15, %v4958_v23  ;;  %3864 = vmatpush3.bf16.msra.mxu0 %v4844_v1  ;;  %v1800_v34 = vrot.slane %v5406_v22, 5  ;;  %v1803_v35 = vrot.slane %v5409_v10, 6  ;;  %v1809_v52 = vrot.slane %v5431_v49, 5  ;;  %v1812_v44 = vrot.slane %v5434_v63, 6  ;;  %vm6126_vm10 = vmmov %vm6122_vm3 }
 0x135   :  { %4100 = vmatmul.mubr.bf16.gmra.mrb[4].mxu1 %v1787_v3  ;;  %3865 = vmatprep.subr.bf16.mxu0 %v4958_v23  ;;  %v1181_v1 = vrot.slane %v5446_v55, 1  ;;  %v688_v3 = vor.u32 %v5307_v5, %v684_v2  ;;  %v5489_v2 = vld [vmem:[#allocation2 + $0x68] sm:$0x3]  ;;  %vm6127_vm13 = vmmov %vm6122_vm3 }
 0x136   :  { %4103 = vmatprep.mubr.msk.bf16.mxu1 %vm6121_vm15, %v4958_v23  ;;  %4132 = vmatpush3.bf16.msra.mxu1 %v4833_v61  ;;  %v1804_v46 = vor.u32 %v1803_v35, %v1800_v34  ;;  %v1813_v61 = vor.u32 %v1812_v44, %v1809_v52  ;;  %vm6128_vm0 = vmmov %vm6122_vm3 }
 0x137   :  { %4133 = vmatprep.subr.bf16.mxu1 %v4958_v23  ;;  %v5473_v26 = vsel %vm1157_vm11, %v1179_v8, %v1181_v1  ;;  %vm6129_vm6 = vmmov %vm6128_vm0 }
 0x138   :  { %3866 = vmatpush3.bf16.msra.mxu0 %v4846_v20  ;;  %v1805_v51 = vsel %vm476_vm14, %v1795_v21, %v1804_v46  ;;  %v1814_v19 = vsel %vm476_vm14, %v1804_v46, %v1813_v61  ;;  %v1818_v20 = vrot.slane %v5455_v0, 5  ;;  %v1821_v21 = vrot.slane %v5460_v7, 6  ;;  %vm6130_vm1 = vmmov %vm6128_vm0 }
 0x139   :  { %3867 = vmatprep.subr.bf16.mxu0 %v4958_v23  ;;  %v1827_v46 = vrot.slane %v4959_v25, 5  ;;  %v1837_v25 = vshll.u32 %v5489_v2, 16  ;;  %vm6131_vm9 = vmmov %vm6128_vm0 }
 0x13a   :  { %4134 = vmatpush3.bf16.msra.mxu1 %v4835_v17  ;;  %v693_v17 = vsel %vm641_vm12, %v688_v3, %v692_v16  ;;  %v1822_v34 = vor.u32 %v1821_v21, %v1818_v20  ;;  %v2658_v3 = vrot.slane %v5409_v10, 3  ;;  %v2662_v21 = vrot.slane %v5434_v63, 3  ;;  %vm6132_vm4 = vmmov %vm6128_vm0 }
 0x13b   :  { %4135 = vmatprep.subr.bf16.mxu1 %v4958_v23  ;;  %3816 = vmatmul.mubr.bf16.gmra.mrb[28].mxu0 %v677_v39  ;;  %v2642_v39 = vrot.slane %v5310_v6, 3 }
 0x13c   :  { %3819 = vmatprep.mubr.msk.bf16.mxu0 %vm6121_vm15, %v4958_v23  ;;  %3868 = vmatpush3.bf16.msra.mxu0 %v4847_v28  ;;  %v696_v28 = vor.u32 %v5332_v32, %v692_v16  ;;  %v2657_v16 = vrot.slane %v5406_v22, 2 }
 0x13d   :  { %4104 = vmatmul.mubr.bf16.gmra.mrb[8].mxu1 %v1796_v30  ;;  %3869 = vmatprep.subr.bf16.mxu0 %v4958_v23  ;;  %v700_v30 = vrot.slane %v5346_v42, 1 }
 0x13e   :  { %4107 = vmatprep.mubr.msk.bf16.mxu1 %vm6121_vm15, %v4958_v23  ;;  %4136 = vmatpush3.bf16.msra.mxu1 %v4836_v31  ;;  %v2641_v31 = vrot.slane %v5307_v5, 2  ;;  %v2650_v5 = vrot.slane %v5346_v42, 3  ;;  %v1834_v42 = vshrl.u32 %v5489_v2, 16 }
 0x13f   :  { %4137 = vmatprep.subr.bf16.mxu1 %v4958_v23  ;;  %v701_v6 = vsel %vm641_vm12, %v696_v28, %v700_v30  ;;  %v2665_v28 = vrot.slane %v5455_v0, 2 }
 0x140   :  { %3870 = vmatpush3.bf16.msra.mxu0 %v4848_v45  ;;  %v5483_v35 = vor.u32 %v2642_v39, %v2641_v31  ;;  %v2649_v45 = vrot.slane %v5343_v37, 2  ;;  %v1831_v31 = vor.u32 %v1830_v33, %v1827_v46  ;;  %v2659_v39 = vor.u32 %v2658_v3, %v2657_v16 }
 0x141   :  { %3923 = vmatprep.subr.bf16.mxu0 %v4958_v23  ;;  %v716_v33 = vrot.slane %v5409_v10, 1  ;;  %v1746_v16 = vrot.slane %v5394_v9, 5  ;;  %v1749_v3 = vrot.slane %v5358_v50, 6  ;;  %v1758_v10 = vrot.slane %v5397_v12, 6 }
 0x142   :  { %4138 = vmatpush3.bf16.msra.mxu1 %v4838_v41  ;;  %v2645_v41 = vrot.slane %v5332_v32, 2  ;;  %v1823_v32 = vsel %vm476_vm14, %v1813_v61, %v1822_v34  ;;  %v2651_v52 = vor.u32 %v2650_v5, %v2649_v45  ;;  %v1836_v5 = vrot.slane %v1834_v42, 5 }
 0x143   :  { %4139 = vmatprep.subr.bf16.mxu1 %v4958_v23  ;;  %3820 = vmatmul.mubr.bf16.gmra.mrb[32].mxu0 %v685_v18  ;;  %v2653_v18 = vrot.slane %v5376_v57, 2  ;;  %v1832_v46 = vsel %vm476_vm14, %v1822_v34, %v1831_v31  ;;  %v1737_v34 = vrot.slane %v5371_v11, 5 }
 0x144   :  { %3823 = vmatprep.mubr.msk.bf16.mxu0 %vm6121_vm15, %v4958_v23 }
 0x145   :  { %4108 = vmatmul.mubr.bf16.gmra.mrb[12].mxu1 %v1805_v51  ;;  %v2654_v51 = vrot.slane %v5379_v58, 3 }
 0x146   :  { %4111 = vmatprep.mubr.msk.bf16.mxu1 %vm6121_vm15, %v4958_v23  ;;  %4140 = vmatpush3.bf16.msra.mxu1 %v4840_v13  ;;  %v2647_v13 = vor.u32 %v2646_v43, %v2645_v41  ;;  %v2666_v41 = vrot.slane %v5460_v7, 3  ;;  %v708_v43 = vrot.slane %v5379_v58, 1 }
 0x147   :  { %4141 = vmatprep.subr.bf16.mxu1 %v4958_v23 }
 0x148   :  { %v5502_v44 = vsel %vm2620_vm2, %v5483_v35, %v2647_v13  ;;  %v5509_v61 = vsel %vm2620_vm2, %v2647_v13, %v2651_v52 }
 0x14a   :  { %4142 = vmatpush3.bf16.msra.mxu1 %v4841_v56  ;;  %v2655_v56 = vor.u32 %v2654_v51, %v2653_v18 }
 0x14b   :  { %4195 = vmatprep.subr.bf16.mxu1 %v4958_v23  ;;  %3824 = vmatmul.mubr.bf16.gmra.mrb[36].mxu0 %v693_v17  ;;  %v2661_v17 = vrot.slane %v5431_v49, 2 }
 0x14c   :  { %3827 = vmatprep.mubr.msk.bf16.mxu0 %vm6121_vm15, %v4958_v23  ;;  %v5515_v20 = vsel %vm2620_vm2, %v2651_v52, %v2655_v56  ;;  %v5522_v13 = vsel %vm2620_vm2, %v2655_v56, %v2659_v39  ;;  %v712_v52 = vor.u32 %v5376_v57, %v708_v43  ;;  %v1740_v56 = vrot.slane %v5323_v4, 6  ;;  %v2064_v57 = vld [vmem:[#allocation2] sm:$0xc0] }
 0x14d   :  { %4112 = vmatmul.mubr.bf16.gmra.mrb[16].mxu1 %v1814_v19  ;;  %v704_v19 = vor.u32 %v5343_v37, %v700_v30  ;;  %v2663_v45 = vor.u32 %v2662_v21, %v2661_v17  ;;  %v2667_v37 = vor.u32 %v2666_v41, %v2665_v28  ;;  %v1750_v21 = vor.u32 %v1749_v3, %v1746_v16 }
 0x14e   :  { %4115 = vmatprep.mubr.msk.bf16.mxu1 %vm6121_vm15, %v4958_v23  ;;  %v5548_v17 = vor.u32 %v1740_v56, %v1737_v34  ;;  %v724_v28 = vrot.slane %v5434_v63, 1  ;;  %v4845_v63 = vld [vmem:[#allocation3 + $0x188] sm:$0xff]   ;;  %v738_v34 = vshll.u32 %v5446_v55, 16  ;;  %v2089_v16 = vrot.slane %v5340_v27, 6 }
 0x14f   :  { %v709_v30 = vsel %vm641_vm12, %v704_v19, %v708_v43  ;;  %v5526_v18 = vsel %vm2620_vm2, %v2659_v39, %v2663_v45  ;;  %v5530_v51 = vsel %vm2620_vm2, %v2663_v45, %v2667_v37  ;;  %v5534_v58 = vsel %vm2620_vm2, %v2667_v37, %v5152_v47  ;;  %v4843_v37 = vld [vmem:[#allocation3 + $0x180] sm:$0xff]  }
 0x150   :  { %v1755_v19 = vrot.slane %v5422_v36, 5  ;;  %v720_v39 = vor.u32 %v5406_v22, %v716_v33  ;;  %v5560_v41 = vsel %vm476_vm14, %v5548_v17, %v1750_v21  ;;  %v2084_v43 = vrot.slane %v2064_v57, 6 }
 0x151   :  { %v2085_v45 = vrot.slane %v5288_v38, 6  ;;  %v740_v56 = vrot.slane %v738_v34, 1  ;;  %v2099_v34 = vrot.slane %v5366_v53, 6 }
 0x153   :  { %3828 = vmatmul.mubr.bf16.gmra.mrb[40].mxu0 %v701_v6  ;;  %v1839_v6 = vrot.slane %v1837_v25, 6  ;;  %v717_v25 = vsel %vm641_vm12, %v712_v52, %v716_v33  ;;  %v2086_v22 = vsel %vm6122_vm3, %v2084_v43, %v2085_v45  ;;  %v4849_v33 = vld [vmem:[#allocation3 + $0x190] sm:$0xff]   ;;  %v2093_v43 = vrot.slane %v5302_v54, 6  ;;  %vm6134_vm3 = vmmov %vm6128_vm0 }
 0x154   :  { %3831 = vmatprep.mubr.msk.bf16.mxu0 %vm6121_vm15, %v4958_v23 }
 0x155   :  { %4116 = vmatmul.mubr.bf16.gmra.mrb[20].mxu1 %v1823_v32  ;;  %v1840_v32 = vor.u32 %v1839_v6, %v1836_v5 }
 0x156   :  { %4119 = vmatprep.mubr.msk.bf16.mxu1 %vm6121_vm15, %v4958_v23 }
 0x157   :  { %v1841_v42 = vsel %vm476_vm14, %v1831_v31, %v1840_v32  ;;  %v1759_v31 = vor.u32 %v1758_v10, %v1755_v19  ;;  %v732_v32 = vrot.slane %v5460_v7, 1  ;;  %v742_v10 = vshrl.u32 %v5446_v55, 16 }
 0x159   :  { %v5564_v5 = vsel %vm476_vm14, %v1750_v21, %v1759_v31  ;;  %v5568_v6 = vsel %vm476_vm14, %v1759_v31, %v5353_v48  ;;  %v2087_v48 = vrot.slane %v5304_v62, 6  ;;  %v736_v7 = vor.u32 %v5455_v0, %v732_v32  ;;  %v4853_v0 = vld [vmem:[#allocation3 + $0x1a8] sm:$0xff]   ;;  %v4855_v31 = vld [vmem:[#allocation3 + $0x1b0] sm:$0xff]  }
 0x15a   :  { %v744_v57 = vor.u32 %v742_v10, %v740_v56  ;;  %v2091_v21 = vrot.slane %v5383_v60, 6 }
 0x15b   :  { %3832 = vmatmul.mubr.bf16.gmra.mrb[44].mxu0 %v709_v30  ;;  %v725_v30 = vsel %vm641_vm12, %v720_v39, %v724_v28  ;;  %v741_v3 = vsel %vm641_vm12, %v736_v7, %v740_v56  ;;  %v2090_v19 = vsel %vm6124_vm5, %v2087_v48, %v2089_v16  ;;  %v4864_v7 = vld [vmem:[#allocation3 + $0xb8] sm:$0xff]   ;;  %v2101_v56 = vrot.slane %v5399_v15, 6 }
 0x15c   :  { %3835 = vmatprep.mubr.msk.bf16.mxu0 %vm6121_vm15, %v4958_v23  ;;  %v2092_v39 = vsel %vm6125_vm8, %v2089_v16, %v2091_v21 }
 0x15d   :  { %4120 = vmatmul.mubr.bf16.gmra.mrb[24].mxu1 %v1832_v46  ;;  %v728_v46 = vor.u32 %v5431_v49, %v724_v28  ;;  %v4850_v49 = vld [vmem:[#allocation3 + $0x198] sm:$0xff]   ;;  %v2102_v16 = vsel %vm6130_vm1, %v2099_v34, %v2101_v56 }
 0x15e   :  { %4123 = vmatprep.mubr.msk.bf16.mxu1 %vm6121_vm15, %v4958_v23  ;;  %v4857_v28 = vld [vmem:[#allocation3 + $0x1b8] sm:$0xff]  }
 0x15f   :  { %v733_v52 = vsel %vm641_vm12, %v728_v46, %v732_v32  ;;  %v4858_v46 = vld [vmem:[#allocation3 + $0x98] sm:$0xff]   ;;  %v4860_v32 = vld [vmem:[#allocation3 + $0xa0] sm:$0xff]   ;;  %vm6133_vm12 = vmmov %vm6128_vm0 }
 0x163   :  { %3836 = vmatmul.mubr.bf16.gmra.mrb[48].mxu0 %v717_v25  ;;  %v4851_v25 = vld [vmem:[#allocation3 + $0x1a0] sm:$0xff]  }
 0x164   :  { %3839 = vmatprep.mubr.msk.bf16.mxu0 %vm6121_vm15, %v4958_v23 }
 0x165   :  { %4124 = vmatmul.mubr.bf16.gmra.mrb[28].mxu1 %v1841_v42  ;;  %v2088_v42 = vsel %vm6123_vm7, %v2085_v45, %v2087_v48  ;;  %v4852_v45 = vld [vmem:[#allocation3 + $0x80] sm:$0xff]   ;;  %v2097_v48 = vrot.slane %v5327_v24, 6  ;;  %vm2354_vm7 = vcmask 1045504  }
 0x166   :  { %4143 = vmatprep.mubr.msk.bf16.mxu1 %vm6121_vm15, %v4958_v23 }
 0x16b   :  { %3840 = vmatmul.mubr.bf16.gmra.mrb[52].mxu0 %v725_v30  ;;  %v4854_v30 = vld [vmem:[#allocation3 + $0x88] sm:$0xff]  }
 0x16c   :  { %3843 = vmatprep.mubr.msk.bf16.mxu0 %vm6121_vm15, %v4958_v23 }
 0x16d   :  { %4144 = vmatmul.mubr.bf16.vlgmr.msra.gmra.mrb[32].mxu1 %v2086_v22  ;;  %v2095_v22 = vrot.slane %v5314_v14, 6 }
 0x16e   :  { %4196 = vmatpush3.bf16.msra.mxu1 %v4843_v37  ;;  %4147 = vmatprep.mubr.msk.bf16.mxu1 %vm6121_vm15, %v4958_v23  ;;  %v2094_v37 = vsel %vm6126_vm10, %v2091_v21, %v2093_v43 }
 0x16f   :  { %4197 = vmatprep.subr.bf16.mxu1 %v4958_v23 }
 0x172   :  { %4198 = vmatpush3.bf16.msra.mxu1 %v4845_v63  ;;  %v4856_v63 = vld [vmem:[#allocation3 + $0x90] sm:$0xff]  }
 0x173   :  { %4199 = vmatprep.subr.bf16.mxu1 %v4958_v23  ;;  %3844 = vmatmul.mubr.bf16.gmra.mrb[56].mxu0 %v733_v52  ;;  %v4862_v52 = vld [vmem:[#allocation3 + $0xa8] sm:$0xff]  }
 0x174   :  { %3847 = vmatprep.mubr.msk.bf16.mxu0 %vm6121_vm15, %v4958_v23 }
 0x175   :  { %4148 = vmatmul.mubr.bf16.gmra.mrb[36].mxu1 %v2088_v42  ;;  %v4863_v42 = vld [vmem:[#allocation3 + $0xb0] sm:$0xff]  }
 0x176   :  { %4151 = vmatprep.mubr.msk.bf16.mxu1 %vm6121_vm15, %v4958_v23  ;;  %4200 = vmatpush3.bf16.msra.mxu1 %v4849_v33  ;;  %v2098_v33 = vsel %vm6128_vm0, %v2095_v22, %v2097_v48 }
 0x177   :  { %4201 = vmatprep.subr.bf16.mxu1 %v4958_v23 }
 0x17a   :  { %4202 = vmatpush3.bf16.msra.mxu1 %v4850_v49  ;;  %v2100_v49 = vsel %vm6129_vm6, %v2097_v48, %v2099_v34  ;;  %v2360_v48 = vrot.slane %v5383_v60, 2  ;;  %v2362_v34 = vrot.slane %v5302_v54, 2 }
 0x17b   :  { %4203 = vmatprep.subr.bf16.mxu1 %v4958_v23  ;;  %3848 = vmatmul.mubr.bf16.gmra.mrb[60].mxu0 %v741_v3 }
 0x17c   :  { %3851 = vmatprep.mubr.msk.bf16.mxu0 %vm6121_vm15, %v4958_v23 }
 0x17d   :  { %4152 = vmatmul.mubr.bf16.gmra.mrb[40].mxu1 %v2090_v19  ;;  %v2105_v19 = vrot.slane %v5451_v59, 6 }
 0x17e   :  { %4155 = vmatprep.mubr.msk.bf16.mxu1 %vm6121_vm15, %v4958_v23  ;;  %4204 = vmatpush3.bf16.msra.mxu1 %v4851_v25  ;;  %v2103_v25 = vrot.slane %v5424_v40, 6 }
 0x17f   :  { %4205 = vmatprep.subr.bf16.mxu1 %v4958_v23 }
 0x180   :  { %v2104_v3 = vsel %vm6131_vm9, %v2101_v56, %v2103_v25  ;;  %v2106_v10 = vsel %vm6132_vm4, %v2103_v25, %v2105_v19  ;;  %v1126_v56 = vld [vmem:[#allocation2] sm:$0xfe]  ;;  %vm6145_vm4 = vcmask 1044480  }
 0x181   :  { %v1158_v25 = vrot.slane %v1126_v56, 1  ;;  %v2374_v56 = vrot.slane %v5451_v59, 2 }
 0x182   :  { %4206 = vmatpush3.bf16.msra.mxu1 %v4853_v0  ;;  %v5666_v0 = vld [vmem:[#allocation2 + $0x60] sm:$0xff] }
 0x183   :  { %4207 = vmatprep.subr.bf16.mxu1 %v4958_v23  ;;  %3852 = vmatmul.mubr.bf16.gmra.mrb[64].mxu0 %v744_v57  ;;  %v2107_v57 = vrot.slane %v5666_v0, 6 }
 0x184   :  { %3871 = vmatprep.mubr.msk.bf16.mxu0 %vm6121_vm15, %v4958_v23 }
 0x185   :  { %4156 = vmatmul.mubr.bf16.gmra.mrb[44].mxu1 %v2092_v39  ;;  %v2108_v21 = vsel %vm6133_vm12, %v2105_v19, %v2107_v57  ;;  %v2364_v19 = vrot.slane %v5314_v14, 2 }
 0x186   :  { %4159 = vmatprep.mubr.msk.bf16.mxu1 %vm6121_vm15, %v4958_v23  ;;  %4208 = vmatpush3.bf16.msra.mxu1 %v4855_v31  ;;  %v2109_v31 = vrot.slane %v5489_v2, 6 }
 0x187   :  { %4209 = vmatprep.subr.bf16.mxu1 %v4958_v23 }
 0x188   :  { %v2110_v39 = vsel %vm6134_vm3, %v2107_v57, %v2109_v31  ;;  %v1161_v31 = vrot.slane %v5304_v62, 1  ;;  %vm6147_vm3 = vmmov %vm6145_vm4 }
 0x18a   :  { %4210 = vmatpush3.bf16.msra.mxu1 %v4857_v28  ;;  %v5680_v28 = vld [vmem:[#allocation2 + $0x8] sm:$0xfc] }
 0x18b   :  { %4263 = vmatprep.subr.bf16.mxu1 %v4958_v23  ;;  %3872 = vmatmul.mubr.bf16.vlgmr.msra.gmra.mrb[16].mxu0 %v5280_v29  ;;  %v2096_v29 = vsel %vm6127_vm13, %v2093_v43, %v2095_v22  ;;  %v2355_v43 = vrot.slane %v5680_v28, 2  ;;  %v2358_v22 = vrot.slane %v5340_v27, 2 }
 0x18c   :  { %3875 = vmatprep.mubr.msk.bf16.mxu0 %vm6121_vm15, %v4958_v23  ;;  %3924 = vmatpush3.bf16.msra.mxu0 %v4852_v45  ;;  %v2356_v45 = vrot.slane %v5304_v62, 2 }
 0x18d   :  { %4160 = vmatmul.mubr.bf16.gmra.mrb[48].mxu1 %v2094_v37  ;;  %3925 = vmatprep.subr.bf16.mxu0 %v4958_v23  ;;  %v4859_v37 = vld [vmem:[#allocation3 + $0x1c0] sm:$0xff]  }
 0x18e   :  { %4163 = vmatprep.mubr.msk.bf16.mxu1 %vm6121_vm15, %v4958_v23  ;;  %v2357_v2 = vsel %vm2354_vm7, %v2355_v43, %v2356_v45  ;;  %v4872_v43 = vld [vmem:[#allocation3 + $0xd0] sm:$0xff]  }
 0x190   :  { %3926 = vmatpush3.bf16.msra.mxu0 %v4854_v30  ;;  %v4861_v30 = vld [vmem:[#allocation3 + $0x1c8] sm:$0xff]  }
 0x191   :  { %3927 = vmatprep.subr.bf16.mxu0 %v4958_v23 }
 0x193   :  { %3876 = vmatmul.mubr.bf16.gmra.mrb[20].mxu0 %v5288_v38 }
 0x194   :  { %3879 = vmatprep.mubr.msk.bf16.mxu0 %vm6121_vm15, %v4958_v23  ;;  %3928 = vmatpush3.bf16.msra.mxu0 %v4856_v63  ;;  %v4865_v63 = vld [vmem:[#allocation3 + $0x1d0] sm:$0xff]  }
 0x195   :  { %4164 = vmatmul.mubr.bf16.gmra.mrb[0].mxu1 %v2096_v29  ;;  %3929 = vmatprep.subr.bf16.mxu0 %v4958_v23  ;;  %v2359_v29 = vsel %vm2354_vm7, %v2356_v45, %v2358_v22 }
 0x196   :  { %4167 = vmatprep.mubr.msk.bf16.mxu1 %vm6121_vm15, %v4958_v23 }
 0x198   :  { %3930 = vmatpush3.bf16.msra.mxu0 %v4858_v46  ;;  %v4866_v46 = vld [vmem:[#allocation3 + $0x1d8] sm:$0xff]  }
 0x199   :  { %3931 = vmatprep.subr.bf16.mxu0 %v4958_v23 }
 0x19b   :  { %3880 = vmatmul.mubr.bf16.gmra.mrb[24].mxu0 %v5304_v62  ;;  %v4874_v62 = vld [vmem:[#allocation3 + $0xd8] sm:$0xff]  }
 0x19c   :  { %3883 = vmatprep.mubr.msk.bf16.mxu0 %vm6121_vm15, %v4958_v23  ;;  %3932 = vmatpush3.bf16.msra.mxu0 %v4860_v32  ;;  %v4867_v32 = vld [vmem:[#allocation3 + $0x1e0] sm:$0xff]  }
 0x19d   :  { %4168 = vmatmul.mubr.bf16.gmra.mrb[4].mxu1 %v2098_v33  ;;  %3933 = vmatprep.subr.bf16.mxu0 %v4958_v23  ;;  %v2361_v33 = vsel %vm2354_vm7, %v2358_v22, %v2360_v48  ;;  %v4876_v22 = vld [vmem:[#allocation3 + $0xe0] sm:$0xff]  }
 0x19e   :  { %4171 = vmatprep.mubr.msk.bf16.mxu1 %vm6121_vm15, %v4958_v23 }
 0x1a0   :  { %3934 = vmatpush3.bf16.msra.mxu0 %v4862_v52  ;;  %v4869_v52 = vld [vmem:[#allocation3 + $0x1e8] sm:$0xff]  }
 0x1a1   :  { %3935 = vmatprep.subr.bf16.mxu0 %v4958_v23 }
 0x1a3   :  { %3884 = vmatmul.mubr.bf16.gmra.mrb[28].mxu0 %v5340_v27 }
 0x1a4   :  { %3887 = vmatprep.mubr.msk.bf16.mxu0 %vm6121_vm15, %v4958_v23  ;;  %3936 = vmatpush3.bf16.msra.mxu0 %v4863_v42  ;;  %v606_v42 = vld [vmem:[#allocation2 + $0x60] sm:$0xf] }
 0x1a5   :  { %4172 = vmatmul.mubr.bf16.gmra.mrb[8].mxu1 %v2100_v49  ;;  %3937 = vmatprep.subr.bf16.mxu0 %v4958_v23  ;;  %v4871_v49 = vld [vmem:[#allocation3 + $0x1f0] sm:$0xff]  }
 0x1a6   :  { %4175 = vmatprep.mubr.msk.bf16.mxu1 %vm6121_vm15, %v4958_v23 }
 0x1a8   :  { %3938 = vmatpush3.bf16.msra.mxu0 %v4864_v7  ;;  %v2363_v7 = vsel %vm2354_vm7, %v2360_v48, %v2362_v34  ;;  %v2370_v48 = vrot.slane %v5399_v15, 2 }
 0x1a9   :  { %3991 = vmatprep.subr.bf16.mxu0 %v4958_v23 }
 0x1ab   :  { %3888 = vmatmul.mubr.bf16.gmra.mrb[32].mxu0 %v5383_v60 }
 0x1ac   :  { %3891 = vmatprep.mubr.msk.bf16.mxu0 %vm6121_vm15, %v4958_v23 }
 0x1ad   :  { %4176 = vmatmul.mubr.bf16.gmra.mrb[12].mxu1 %v2102_v16  ;;  %v4873_v16 = vld [vmem:[#allocation3 + $0x1f8] sm:$0xff]  }
 0x1ae   :  { %4179 = vmatprep.mubr.msk.bf16.mxu1 %vm6121_vm15, %v4958_v23 }
 0x1b3   :  { %3892 = vmatmul.mubr.bf16.gmra.mrb[36].mxu0 %v5302_v54 }
 0x1b4   :  { %3895 = vmatprep.mubr.msk.bf16.mxu0 %vm6121_vm15, %v4958_v23 }
 0x1b5   :  { %4180 = vmatmul.mubr.bf16.gmra.mrb[16].mxu1 %v2104_v3  ;;  %v1159_v3 = vrot.slane %v5288_v38, 1  ;;  %v4870_v38 = vld [vmem:[#allocation3 + $0xc8] sm:$0xff]  }
 0x1b6   :  { %4183 = vmatprep.mubr.msk.bf16.mxu1 %vm6121_vm15, %v4958_v23 }
 0x1b7   :  { %v1160_v57 = vsel %vm1157_vm11, %v1158_v25, %v1159_v3  ;;  %v1162_v45 = vsel %vm1157_vm11, %v1159_v3, %v1161_v31  ;;  %v1171_v3 = vrot.slane %v5327_v24, 1 }
 0x1bb   :  { %3896 = vmatmul.mubr.bf16.gmra.mrb[40].mxu0 %v5314_v14 }
 0x1bc   :  { %3899 = vmatprep.mubr.msk.bf16.mxu0 %vm6121_vm15, %v4958_v23 }
 0x1bd   :  { %4184 = vmatmul.mubr.bf16.gmra.mrb[20].mxu1 %v2106_v10  ;;  %v4868_v10 = vld [vmem:[#allocation3 + $0xc0] sm:$0xff]  }
 0x1be   :  { %4187 = vmatprep.mubr.msk.bf16.mxu1 %vm6121_vm15, %v4958_v23 }
 0x1c3   :  { %3900 = vmatmul.mubr.bf16.gmra.mrb[44].mxu0 %v5327_v24 }
 0x1c4   :  { %3903 = vmatprep.mubr.msk.bf16.mxu0 %vm6121_vm15, %v4958_v23 }
 0x1c5   :  { %4188 = vmatmul.mubr.bf16.gmra.mrb[24].mxu1 %v2108_v21  ;;  %v2365_v21 = vsel %vm2354_vm7, %v2362_v34, %v2364_v19  ;;  %v1167_v34 = vrot.slane %v5302_v54, 1  ;;  %v1169_v54 = vrot.slane %v5314_v14, 1 }
 0x1c6   :  { %4191 = vmatprep.mubr.msk.bf16.mxu1 %vm6121_vm15, %v4958_v23 }
 0x1c7   :  { %v1172_v14 = vsel %vm1157_vm11, %v1169_v54, %v1171_v3 }
 0x1cb   :  { %3904 = vmatmul.mubr.bf16.gmra.mrb[48].mxu0 %v5366_v53 }
 0x1cc   :  { %3907 = vmatprep.mubr.msk.bf16.mxu0 %vm6121_vm15, %v4958_v23 }
 0x1cd   :  { %4192 = vmatmul.mubr.bf16.gmra.mrb[28].mxu1 %v2110_v39  ;;  %v2366_v39 = vrot.slane %v5327_v24, 2 }
 0x1ce   :  { %4211 = vmatprep.mubr.msk.bf16.mxu1 %vm6121_vm15, %v4958_v23 }
 0x1d3   :  { %3908 = vmatmul.mubr.bf16.gmra.mrb[52].mxu0 %v5399_v15 }
 0x1d4   :  { %3911 = vmatprep.mubr.msk.bf16.mxu0 %vm6121_vm15, %v4958_v23 }
 0x1d5   :  { %4212 = vmatmul.mubr.bf16.vlgmr.msra.gmra.mrb[32].mxu1 %v2357_v2  ;;  %v1163_v2 = vrot.slane %v5340_v27, 1  ;;  %v4878_v27 = vld [vmem:[#allocation3 + $0xe8] sm:$0xff]  }
 0x1d6   :  { %4264 = vmatpush3.bf16.msra.mxu1 %v4859_v37  ;;  %4215 = vmatprep.mubr.msk.bf16.mxu1 %vm6121_vm15, %v4958_v23  ;;  %v2367_v37 = vsel %vm2354_vm7, %v2364_v19, %v2366_v39  ;;  %v2376_v19 = vrot.slane %v5666_v0, 2 }
 0x1d7   :  { %4265 = vmatprep.subr.bf16.mxu1 %v4958_v23 }
 0x1da   :  { %4266 = vmatpush3.bf16.msra.mxu1 %v4861_v30  ;;  %v2368_v30 = vrot.slane %v5366_v53, 2 }
 0x1db   :  { %4267 = vmatprep.subr.bf16.mxu1 %v4958_v23  ;;  %3912 = vmatmul.mubr.bf16.gmra.mrb[56].mxu0 %v5424_v40 }
 0x1dc   :  { %3915 = vmatprep.mubr.msk.bf16.mxu0 %vm6121_vm15, %v4958_v23 }
 0x1dd   :  { %4216 = vmatmul.mubr.bf16.gmra.mrb[36].mxu1 %v2359_v29  ;;  %v2369_v29 = vsel %vm2354_vm7, %v2366_v39, %v2368_v30  ;;  %v1175_v39 = vrot.slane %v5399_v15, 1  ;;  %v1177_v15 = vrot.slane %v5424_v40, 1 }
 0x1de   :  { %4219 = vmatprep.mubr.msk.bf16.mxu1 %vm6121_vm15, %v4958_v23  ;;  %4268 = vmatpush3.bf16.msra.mxu1 %v4865_v63  ;;  %v1164_v63 = vsel %vm1157_vm11, %v1161_v31, %v1163_v2 }
 0x1df   :  { %4269 = vmatprep.subr.bf16.mxu1 %v4958_v23 }
 0x1e2   :  { %4270 = vmatpush3.bf16.msra.mxu1 %v4866_v46  ;;  %v1165_v46 = vrot.slane %v5383_v60, 1  ;;  %v4880_v60 = vld [vmem:[#allocation3 + $0xf8] sm:$0xff]  }
 0x1e3   :  { %4271 = vmatprep.subr.bf16.mxu1 %v4958_v23  ;;  %3916 = vmatmul.mubr.bf16.gmra.mrb[60].mxu0 %v5451_v59  ;;  %v4882_v59 = vld [vmem:[#allocation3 + $0x218] sm:$0xff]  }
 0x1e4   :  { %3919 = vmatprep.mubr.msk.bf16.mxu0 %vm6121_vm15, %v4958_v23 }
 0x1e5   :  { %4220 = vmatmul.mubr.bf16.gmra.mrb[40].mxu1 %v2361_v33  ;;  %v1166_v33 = vsel %vm1157_vm11, %v1163_v2, %v1165_v46  ;;  %v2629_v2 = vrot.slane %v5371_v11, 2  ;;  %v2633_v11 = vrot.slane %v5394_v9, 2  ;;  %v1180_v9 = vsel %vm1157_vm11, %v1177_v15, %v1179_v8 }
 0x1e6   :  { %4223 = vmatprep.mubr.msk.bf16.mxu1 %vm6121_vm15, %v4958_v23  ;;  %4272 = vmatpush3.bf16.msra.mxu1 %v4867_v32  ;;  %v4879_v32 = vld [vmem:[#allocation3 + $0xf0] sm:$0xff]  }
 0x1e7   :  { %4273 = vmatprep.subr.bf16.mxu1 %v4958_v23 }
 0x1ea   :  { %4274 = vmatpush3.bf16.msra.mxu1 %v4869_v52  ;;  %v2371_v52 = vsel %vm2354_vm7, %v2368_v30, %v2370_v48  ;;  %v2630_v30 = vrot.slane %v5323_v4, 3  ;;  %v2634_v4 = vrot.slane %v5358_v50, 3 }
 0x1eb   :  { %4275 = vmatprep.subr.bf16.mxu1 %v4958_v23  ;;  %3920 = vmatmul.mubr.bf16.gmra.mrb[64].mxu0 %v606_v42  ;;  %v2372_v42 = vrot.slane %v5424_v40, 2  ;;  %v4877_v40 = vld [vmem:[#allocation3 + $0x208] sm:$0xff]  }
 0x1ec   :  { %3939 = vmatprep.mubr.msk.bf16.mxu0 %vm6121_vm15, %v4958_v23 }
 0x1ed   :  { %4224 = vmatmul.mubr.bf16.gmra.mrb[44].mxu1 %v2363_v7  ;;  %v2373_v7 = vsel %vm2354_vm7, %v2370_v48, %v2372_v42  ;;  %v2375_v25 = vsel %vm2354_vm7, %v2372_v42, %v2374_v56  ;;  %v4881_v48 = vld [vmem:[#allocation3 + $0x210] sm:$0xff]   ;;  %v4886_v42 = vld [vmem:[#allocation3 + $0x238] sm:$0xff]  }
 0x1ee   :  { %4227 = vmatprep.mubr.msk.bf16.mxu1 %vm6121_vm15, %v4958_v23  ;;  %4276 = vmatpush3.bf16.msra.mxu1 %v4871_v49  ;;  %v1168_v49 = vsel %vm1157_vm11, %v1165_v46, %v1167_v34  ;;  %v2635_v46 = vor.u32 %v2634_v4, %v2633_v11 }
 0x1ef   :  { %4277 = vmatprep.subr.bf16.mxu1 %v4958_v23 }
 0x1f2   :  { %4278 = vmatpush3.bf16.msra.mxu1 %v4873_v16  ;;  %v1170_v16 = vsel %vm1157_vm11, %v1167_v34, %v1169_v54  ;;  %v5836_v34 = vld [vmem:[#allocation2] sm:$0xe0]  ;;  %v5853_v54 = vld [vmem:[#allocation2 + $0x10] sm:$0xff] }
 0x1f3   :  { %4331 = vmatprep.subr.bf16.mxu1 %v4958_v23  ;;  %3940 = vmatmul.mubr.bf16.vlgmr.msra.gmra.mrb[16].mxu0 %v1160_v57  ;;  %v2377_v57 = vsel %vm2354_vm7, %v2374_v56, %v2376_v19  ;;  %v1453_v56 = vrot.slane %v5853_v54, 5 }
 0x1f4   :  { %3943 = vmatprep.mubr.msk.bf16.mxu0 %vm6121_vm15, %v4958_v23  ;;  %3992 = vmatpush3.bf16.msra.mxu0 %v4868_v10  ;;  %v2334_v10 = vld [vmem:[#allocation2 + $0x68] sm:$0x3f] }
 0x1f5   :  { %4228 = vmatmul.mubr.bf16.gmra.mrb[48].mxu1 %v2365_v21  ;;  %3993 = vmatprep.subr.bf16.mxu0 %v4958_v23  ;;  %v2378_v21 = vrot.slane %v2334_v10, 2 }
 0x1f6   :  { %4231 = vmatprep.mubr.msk.bf16.mxu1 %vm6121_vm15, %v4958_v23 }
 0x1f7   :  { %v2379_v24 = vsel %vm2354_vm7, %v2376_v19, %v2378_v21 }
 0x1f8   :  { %3994 = vmatpush3.bf16.msra.mxu0 %v4870_v38  ;;  %v1173_v38 = vrot.slane %v5366_v53, 1 }
 0x1f9   :  { %3995 = vmatprep.subr.bf16.mxu0 %v4958_v23 }
 0x1fa   :  { %v1174_v31 = vsel %vm1157_vm11, %v1171_v3, %v1173_v38  ;;  %v1176_v53 = vsel %vm1157_vm11, %v1173_v38, %v1175_v39  ;;  %v5864_v3 = vld [vmem:[#allocation2 + $0x18] sm:$0xff] }
 0x1fb   :  { %3944 = vmatmul.mubr.bf16.gmra.mrb[20].mxu0 %v1162_v45  ;;  %v2625_v45 = vshll.u32 %v5680_v28, 16  ;;  %v1455_v19 = vrot.slane %v5864_v3, 5  ;;  %v4897_v38 = vld [vmem:[#allocation3 + $0x128] sm:$0xff]  }
 0x1fc   :  { %3947 = vmatprep.mubr.msk.bf16.mxu0 %vm6121_vm15, %v4958_v23  ;;  %3996 = vmatpush3.bf16.msra.mxu0 %v4872_v43  ;;  %v2622_v43 = vshrl.u32 %v5680_v28, 16  ;;  %v2631_v28 = vor.u32 %v2630_v30, %v2629_v2  ;;  %v5909_v30 = vld [vmem:[#allocation2 + $0x38] sm:$0xff] }
 0x1fd   :  { %4232 = vmatmul.mubr.bf16.gmra.mrb[0].mxu1 %v2367_v37  ;;  %3997 = vmatprep.subr.bf16.mxu0 %v4958_v23 }
 0x1fe   :  { %4235 = vmatprep.mubr.msk.bf16.mxu1 %vm6121_vm15, %v4958_v23  ;;  %v2624_v37 = vrot.slane %v2622_v43, 2  ;;  %v2636_v50 = vsel %vm2620_vm2, %v2631_v28, %v2635_v46  ;;  %v4900_v43 = vld [vmem:[#allocation3 + $0x138] sm:$0xff]  }
 0x200   :  { %3998 = vmatpush3.bf16.msra.mxu0 %v4874_v62  ;;  %v2627_v62 = vrot.slane %v2625_v45, 3 }
 0x201   :  { %3999 = vmatprep.subr.bf16.mxu0 %v4958_v23 }
 0x203   :  { %3948 = vmatmul.mubr.bf16.gmra.mrb[24].mxu0 %v1164_v63  ;;  %v4875_v63 = vld [vmem:[#allocation3 + $0x200] sm:$0xff]  }
 0x204   :  { %3951 = vmatprep.mubr.msk.bf16.mxu0 %vm6121_vm15, %v4958_v23  ;;  %4000 = vmatpush3.bf16.msra.mxu0 %v4876_v22  ;;  %v2628_v22 = vor.u32 %v2627_v62, %v2624_v37  ;;  %v5900_v62 = vld [vmem:[#allocation2 + $0x68] sm:$0x7f] }
 0x205   :  { %4236 = vmatmul.mubr.bf16.gmra.mrb[4].mxu1 %v2369_v29  ;;  %4001 = vmatprep.subr.bf16.mxu0 %v4958_v23  ;;  %v1178_v29 = vsel %vm1157_vm11, %v1175_v39, %v1177_v15  ;;  %vm6135_vm11 = vcmask 1042432   ;;  %v2677_v2 = vshll.u32 %v5900_v62, 16  ;;  %v1463_v15 = vrot.slane %v5909_v30, 5 }
 0x206   :  { %4239 = vmatprep.mubr.msk.bf16.mxu1 %vm6121_vm15, %v4958_v23  ;;  %vm6136_vm5 = vmmov %vm6135_vm11 }
 0x207   :  { %vm6137_vm8 = vmmov %vm6136_vm5 }
 0x208   :  { %4002 = vmatpush3.bf16.msra.mxu0 %v4878_v27  ;;  %v2632_v27 = vsel %vm2620_vm2, %v2628_v22, %v2631_v28  ;;  %v1456_v10 = vsel %vm6137_vm8, %v1453_v56, %v1455_v19  ;;  %vm6138_vm10 = vmmov %vm6136_vm5  ;;  %v2679_v28 = vrot.slane %v2677_v2, 3 }
 0x209   :  { %4003 = vmatprep.subr.bf16.mxu0 %v4958_v23  ;;  %vm6139_vm13 = vmmov %vm6136_vm5 }
 0x20a   :  { %vm6140_vm0 = vmmov %vm6136_vm5 }
 0x20b   :  { %3952 = vmatmul.mubr.bf16.gmra.mrb[28].mxu0 %v1166_v33  ;;  %v2638_v33 = vrot.slane %v5397_v12, 3  ;;  %vm6141_vm6 = vmmov %vm6140_vm0 }
 0x20c   :  { %3955 = vmatprep.mubr.msk.bf16.mxu0 %vm6121_vm15, %v4958_v23  ;;  %4004 = vmatpush3.bf16.msra.mxu0 %v4879_v32  ;;  %v2637_v32 = vrot.slane %v5422_v36, 2  ;;  %v4884_v36 = vld [vmem:[#allocation3 + $0x228] sm:$0xff]   ;;  %vm6142_vm1 = vmmov %vm6140_vm0 }
 0x20d   :  { %4240 = vmatmul.mubr.bf16.gmra.mrb[8].mxu1 %v2371_v52  ;;  %4005 = vmatprep.subr.bf16.mxu0 %v4958_v23  ;;  %v4883_v52 = vld [vmem:[#allocation3 + $0x220] sm:$0xff]   ;;  %vm6143_vm9 = vmmov %vm6140_vm0 }
 0x20e   :  { %4243 = vmatprep.mubr.msk.bf16.mxu1 %vm6121_vm15, %v4958_v23  ;;  %v2639_v8 = vor.u32 %v2638_v33, %v2637_v32  ;;  %v2925_v32 = vrot.slane %v5853_v54, 3  ;;  %vm6146_vm12 = vmmov %vm6140_vm0  ;;  %v1718_v54 = vshrl.u32 %v5836_v34, 16 }
 0x20f   :  { %vm6148_vm7 = vmmov %vm6140_vm0 }
 0x210   :  { %4006 = vmatpush3.bf16.msra.mxu0 %v4880_v60  ;;  %v2640_v12 = vsel %vm2620_vm2, %v2635_v46, %v2639_v8  ;;  %v4885_v60 = vld [vmem:[#allocation3 + $0x230] sm:$0xff]   ;;  %vm6151_vm8 = vmmov %vm6147_vm3 }
 0x211   :  { %4059 = vmatprep.subr.bf16.mxu0 %v4958_v23 }
 0x213   :  { %3956 = vmatmul.mubr.bf16.gmra.mrb[32].mxu0 %v1168_v49  ;;  %v1450_v49 = vrot.slane %v5836_v34, 5 }
 0x214   :  { %3959 = vmatprep.mubr.msk.bf16.mxu0 %vm6121_vm15, %v4958_v23 }
 0x215   :  { %4244 = vmatmul.mubr.bf16.gmra.mrb[12].mxu1 %v2373_v7  ;;  %v5843_v7 = vld [vmem:[#allocation2 + $0x8] sm:$0xff] }
 0x216   :  { %4247 = vmatprep.mubr.msk.bf16.mxu1 %vm6121_vm15, %v4958_v23  ;;  %v1451_v55 = vrot.slane %v5843_v7, 5 }
 0x21b   :  { %3960 = vmatmul.mubr.bf16.gmra.mrb[36].mxu0 %v1170_v16  ;;  %v4891_v16 = vld [vmem:[#allocation3 + $0x108] sm:$0xff]  }
 0x21c   :  { %3963 = vmatprep.mubr.msk.bf16.mxu0 %vm6121_vm15, %v4958_v23 }
 0x21d   :  { %4248 = vmatmul.mubr.bf16.gmra.mrb[16].mxu1 %v2375_v25  ;;  %v1454_v25 = vsel %vm6136_vm5, %v1451_v55, %v1453_v56  ;;  %v1721_v56 = vshll.u32 %v5836_v34, 16  ;;  %vm6150_vm5 = vmmov %vm6140_vm0 }
 0x21e   :  { %4251 = vmatprep.mubr.msk.bf16.mxu1 %vm6121_vm15, %v4958_v23 }
 0x223   :  { %3964 = vmatmul.mubr.bf16.gmra.mrb[40].mxu0 %v1172_v14  ;;  %v4894_v14 = vld [vmem:[#allocation3 + $0x118] sm:$0xff]  }
 0x224   :  { %3967 = vmatprep.mubr.msk.bf16.mxu0 %vm6121_vm15, %v4958_v23 }
 0x225   :  { %4252 = vmatmul.mubr.bf16.gmra.mrb[20].mxu1 %v2377_v57  ;;  %v5875_v57 = vld [vmem:[#allocation2 + $0x20] sm:$0xff] }
 0x226   :  { %4255 = vmatprep.mubr.msk.bf16.mxu1 %vm6121_vm15, %v4958_v23 }
 0x22b   :  { %3968 = vmatmul.mubr.bf16.gmra.mrb[44].mxu0 %v1174_v31  ;;  %v5886_v31 = vld [vmem:[#allocation2 + $0x28] sm:$0xff] }
 0x22c   :  { %3971 = vmatprep.mubr.msk.bf16.mxu0 %vm6121_vm15, %v4958_v23  ;;  %v1459_v39 = vrot.slane %v5886_v31, 5 }
 0x22d   :  { %4256 = vmatmul.mubr.bf16.gmra.mrb[24].mxu1 %v2379_v24 }
 0x22e   :  { %4259 = vmatprep.mubr.msk.bf16.mxu1 %vm6121_vm15, %v4958_v23 }
 0x233   :  { %3972 = vmatmul.mubr.bf16.gmra.mrb[48].mxu0 %v1176_v53 }
 0x234   :  { %3975 = vmatprep.mubr.msk.bf16.mxu0 %vm6121_vm15, %v4958_v23 }
 0x235   :  { %4260 = vmatmul.mubr.bf16.gmra.mrb[28].mxu1 %v2378_v21  ;;  %v1457_v21 = vrot.slane %v5875_v57, 5 }
 0x236   :  { %4279 = vmatprep.mubr.msk.bf16.mxu1 %vm6121_vm15, %v4958_v23 }
 0x237   :  { %v1458_v24 = vsel %vm6138_vm10, %v1455_v19, %v1457_v21  ;;  %v1460_v45 = vsel %vm6139_vm13, %v1457_v21, %v1459_v39  ;;  %v1720_v19 = vrot.slane %v1718_v54, 5  ;;  %vm6152_vm10 = vmmov %vm6147_vm3 }
 0x238   :  { %vm6153_vm13 = vmmov %vm6147_vm3 }
 0x23b   :  { %3976 = vmatmul.mubr.bf16.gmra.mrb[52].mxu0 %v1178_v29  ;;  %v5918_v29 = vld [vmem:[#allocation2 + $0x40] sm:$0xff] }
 0x23c   :  { %3979 = vmatprep.mubr.msk.bf16.mxu0 %vm6121_vm15, %v4958_v23 }
 0x23d   :  { %4280 = vmatmul.mubr.bf16.vlgmr.msra.gmra.mrb[32].mxu1 %v2632_v27  ;;  %v1465_v27 = vrot.slane %v5918_v29, 5 }
 0x23e   :  { %4332 = vmatpush3.bf16.msra.mxu1 %v4875_v63  ;;  %4283 = vmatprep.mubr.msk.bf16.mxu1 %vm6121_vm15, %v4958_v23 }
 0x23f   :  { %4333 = vmatprep.subr.bf16.mxu1 %v4958_v23  ;;  %v1466_v4 = vsel %vm6142_vm1, %v1463_v15, %v1465_v27 }
 0x242   :  { %4334 = vmatpush3.bf16.msra.mxu1 %v4877_v40 }
 0x243   :  { %4335 = vmatprep.subr.bf16.mxu1 %v4958_v23  ;;  %3980 = vmatmul.mubr.bf16.gmra.mrb[56].mxu0 %v1180_v9 }
 0x244   :  { %3983 = vmatprep.mubr.msk.bf16.mxu0 %vm6121_vm15, %v4958_v23 }
 0x245   :  { %4284 = vmatmul.mubr.bf16.gmra.mrb[36].mxu1 %v2636_v50 }
 0x246   :  { %4287 = vmatprep.mubr.msk.bf16.mxu1 %vm6121_vm15, %v4958_v23  ;;  %4336 = vmatpush3.bf16.msra.mxu1 %v4881_v48  ;;  %v5936_v48 = vld [vmem:[#allocation2 + $0x50] sm:$0xff] }
 0x247   :  { %4337 = vmatprep.subr.bf16.mxu1 %v4958_v23  ;;  %v1469_v9 = vrot.slane %v5936_v48, 5 }
 0x24a   :  { %4338 = vmatpush3.bf16.msra.mxu1 %v4882_v59 }
 0x24b   :  { %4339 = vmatprep.subr.bf16.mxu1 %v4958_v23  ;;  %3984 = vmatmul.mubr.bf16.gmra.mrb[60].mxu0 %v5473_v26  ;;  %v2644_v26 = vsel %vm2620_vm2, %v2639_v8, %v5483_v35  ;;  %v4889_v35 = vld [vmem:[#allocation3 + $0x100] sm:$0xff]   ;;  %v5946_v8 = vld [vmem:[#allocation2 + $0x58] sm:$0xff] }
 0x24c   :  { %3987 = vmatprep.mubr.msk.bf16.mxu0 %vm6121_vm15, %v4958_v23 }
 0x24d   :  { %4288 = vmatmul.mubr.bf16.gmra.mrb[40].mxu1 %v2640_v12  ;;  %v2927_v12 = vrot.slane %v5864_v3, 3 }
 0x24e   :  { %4291 = vmatprep.mubr.msk.bf16.mxu1 %vm6121_vm15, %v4958_v23  ;;  %4340 = vmatpush3.bf16.msra.mxu1 %v4883_v52  ;;  %v1471_v52 = vrot.slane %v5946_v8, 5 }
 0x24f   :  { %4341 = vmatprep.subr.bf16.mxu1 %v4958_v23 }
 0x252   :  { %4342 = vmatpush3.bf16.msra.mxu1 %v4884_v36  ;;  %v1472_v36 = vsel %vm6146_vm12, %v1469_v9, %v1471_v52 }
 0x253   :  { %4343 = vmatprep.subr.bf16.mxu1 %v4958_v23  ;;  %3988 = vmatmul.mubr.bf16.gmra.mrb[64].mxu0 %v1181_v1  ;;  %v1452_v1 = vsel %vm6135_vm11, %v1450_v49, %v1451_v55  ;;  %v1418_v49 = vld [vmem:[#allocation2 + $0x68] sm:$0x1]  ;;  %vm6149_vm11 = vmmov %vm6147_vm3 }
 0x254   :  { %4007 = vmatprep.mubr.msk.bf16.mxu0 %vm6121_vm15, %v4958_v23 }
 0x255   :  { %4292 = vmatmul.mubr.bf16.gmra.mrb[44].mxu1 %v2644_v26  ;;  %v1473_v26 = vrot.slane %v5666_v0, 5 }
 0x256   :  { %4295 = vmatprep.mubr.msk.bf16.mxu1 %vm6121_vm15, %v4958_v23  ;;  %4344 = vmatpush3.bf16.msra.mxu1 %v4885_v60  ;;  %v2928_v60 = vsel %vm6147_vm3, %v2925_v32, %v2927_v12 }
 0x257   :  { %4345 = vmatprep.subr.bf16.mxu1 %v4958_v23  ;;  %v1474_v55 = vsel %vm6148_vm7, %v1471_v52, %v1473_v26 }
 0x25a   :  { %4346 = vmatpush3.bf16.msra.mxu1 %v4886_v42  ;;  %v2929_v42 = vrot.slane %v5875_v57, 3 }
 0x25b   :  { %4008 = vmatmul.mubr.bf16.vlgmr.msra.gmra.mrb[16].mxu0 %v1452_v1 }
 0x25c   :  { %4011 = vmatprep.mubr.msk.bf16.mxu0 %vm6121_vm15, %v4958_v23  ;;  %4060 = vmatpush3.bf16.msra.mxu0 %v4889_v35  ;;  %v2930_v1 = vsel %vm6149_vm11, %v2927_v12, %v2929_v42  ;;  %v1475_v35 = vrot.slane %v1418_v49, 5 }
 0x25d   :  { %4296 = vmatmul.mubr.bf16.gmra.mrb[48].mxu1 %v5502_v44  ;;  %4061 = vmatprep.subr.bf16.mxu0 %v4958_v23  ;;  %v4892_v44 = vld [vmem:[#allocation3 + $0x110] sm:$0xff]  }
 0x25e   :  { %4299 = vmatprep.mubr.msk.bf16.mxu1 %vm6121_vm15, %v4958_v23  ;;  %v1476_v3 = vsel %vm6150_vm5, %v1473_v26, %v1475_v35 }
 0x260   :  { %4062 = vmatpush3.bf16.msra.mxu0 %v4891_v16  ;;  %v1726_v16 = vshrl.u32 %v5843_v7, 16 }
 0x261   :  { %4063 = vmatprep.subr.bf16.mxu0 %v4958_v23 }
 0x263   :  { %4012 = vmatmul.mubr.bf16.gmra.mrb[20].mxu0 %v1454_v25  ;;  %v1729_v25 = vshll.u32 %v5843_v7, 16 }
 0x264   :  { %4015 = vmatprep.mubr.msk.bf16.mxu0 %vm6121_vm15, %v4958_v23  ;;  %4064 = vmatpush3.bf16.msra.mxu0 %v4892_v44  ;;  %v2931_v44 = vrot.slane %v5886_v31, 3 }
 0x265   :  { %4300 = vmatmul.mubr.bf16.gmra.mrb[0].mxu1 %v5509_v61  ;;  %4065 = vmatprep.subr.bf16.mxu0 %v4958_v23  ;;  %v4895_v61 = vld [vmem:[#allocation3 + $0x120] sm:$0xff]  }
 0x266   :  { %4303 = vmatprep.mubr.msk.bf16.mxu1 %vm6121_vm15, %v4958_v23  ;;  %v2932_v57 = vsel %vm6151_vm8, %v2929_v42, %v2931_v44 }
 0x268   :  { %4066 = vmatpush3.bf16.msra.mxu0 %v4894_v14  ;;  %v1723_v14 = vrot.slane %v1721_v56, 6 }
 0x269   :  { %4067 = vmatprep.subr.bf16.mxu0 %v4958_v23 }
 0x26a   :  { %v1724_v34 = vor.u32 %v1723_v14, %v1720_v19 }
 0x26b   :  { %4016 = vmatmul.mubr.bf16.gmra.mrb[24].mxu0 %v1456_v10  ;;  %v1728_v10 = vrot.slane %v1726_v16, 5 }
 0x26c   :  { %4019 = vmatprep.mubr.msk.bf16.mxu0 %vm6121_vm15, %v4958_v23  ;;  %4068 = vmatpush3.bf16.msra.mxu0 %v4895_v61  ;;  %v1731_v61 = vrot.slane %v1729_v25, 6 }
 0x26d   :  { %4304 = vmatmul.mubr.bf16.gmra.mrb[4].mxu1 %v5515_v20  ;;  %4069 = vmatprep.subr.bf16.mxu0 %v4958_v23  ;;  %v4898_v20 = vld [vmem:[#allocation3 + $0x130] sm:$0xff]  }
 0x26e   :  { %4307 = vmatprep.mubr.msk.bf16.mxu1 %vm6121_vm15, %v4958_v23  ;;  %v1732_v7 = vor.u32 %v1731_v61, %v1728_v10 }
 0x270   :  { %4070 = vmatpush3.bf16.msra.mxu0 %v4897_v38  ;;  %v1733_v38 = vsel %vm476_vm14, %v1724_v34, %v1732_v7  ;;  %v1742_v31 = vsel %vm476_vm14, %v1732_v7, %v5548_v17 }
 0x271   :  { %4071 = vmatprep.subr.bf16.mxu0 %v4958_v23 }
 0x273   :  { %4020 = vmatmul.mubr.bf16.gmra.mrb[28].mxu0 %v1458_v24 }
 0x274   :  { %4023 = vmatprep.mubr.msk.bf16.mxu0 %vm6121_vm15, %v4958_v23  ;;  %4072 = vmatpush3.bf16.msra.mxu0 %v4898_v20  ;;  %v2935_v20 = vrot.slane %v5909_v30, 3 }
 0x275   :  { %4308 = vmatmul.mubr.bf16.gmra.mrb[8].mxu1 %v5522_v13  ;;  %4073 = vmatprep.subr.bf16.mxu0 %v4958_v23  ;;  %v5896_v13 = vld [vmem:[#allocation2 + $0x30] sm:$0xff] }
 0x276   :  { %4311 = vmatprep.mubr.msk.bf16.mxu1 %vm6121_vm15, %v4958_v23  ;;  %v1461_v53 = vrot.slane %v5896_v13, 5  ;;  %v2933_v21 = vrot.slane %v5896_v13, 3 }
 0x278   :  { %4074 = vmatpush3.bf16.msra.mxu0 %v4900_v43  ;;  %v1462_v37 = vsel %vm6140_vm0, %v1459_v39, %v1461_v53  ;;  %v1464_v63 = vsel %vm6141_vm6, %v1461_v53, %v1463_v15  ;;  %v2934_v24 = vsel %vm6152_vm10, %v2931_v44, %v2933_v21  ;;  %v2936_v39 = vsel %vm6153_vm13, %v2933_v21, %v2935_v20 }
 0x279   :  { %v2937_v43 = vrot.slane %v5918_v29, 3 }
 0x27b   :  { %4024 = vmatmul.mubr.bf16.gmra.mrb[32].mxu0 %v1460_v45 }
 0x27c   :  { %4027 = vmatprep.mubr.msk.bf16.mxu0 %vm6121_vm15, %v4958_v23 }
 0x27d   :  { %4312 = vmatmul.mubr.bf16.gmra.mrb[12].mxu1 %v5526_v18  ;;  %v2674_v18 = vshrl.u32 %v5900_v62, 16 }
 0x27e   :  { %4315 = vmatprep.mubr.msk.bf16.mxu1 %vm6121_vm15, %v4958_v23 }
 0x27f   :  { %v2676_v22 = vrot.slane %v2674_v18, 2  ;;  %v2945_v18 = vrot.slane %v5666_v0, 3 }
 0x283   :  { %4028 = vmatmul.mubr.bf16.gmra.mrb[36].mxu0 %v1462_v37 }
 0x284   :  { %4031 = vmatprep.mubr.msk.bf16.mxu0 %vm6121_vm15, %v4958_v23 }
 0x285   :  { %4316 = vmatmul.mubr.bf16.gmra.mrb[16].mxu1 %v5530_v51  ;;  %v2680_v51 = vor.u32 %v2679_v28, %v2676_v22 }
 0x286   :  { %4319 = vmatprep.mubr.msk.bf16.mxu1 %vm6121_vm15, %v4958_v23 }
 0x287   :  { %v2681_v11 = vsel %vm2620_vm2, %v5152_v47, %v2680_v51  ;;  %v2904_v47 = vld [vmem:[#allocation2 + $0x8] sm:$0xf8]  ;;  %vm6144_vm2 = vmmov %vm6140_vm0 }
 0x288   :  { %v2924_v50 = vrot.slane %v2904_v47, 3  ;;  %vm6154_vm0 = vmmov %vm6147_vm3 }
 0x289   :  { %v2938_v45 = vsel %vm6154_vm0, %v2935_v20, %v2937_v43  ;;  %vm6155_vm14 = vmmov %vm6154_vm0 }
 0x28a   :  { %v2926_v59 = vsel %vm6145_vm4, %v2924_v50, %v2925_v32  ;;  %vm6156_vm6 = vmmov %vm6154_vm0 }
 0x28b   :  { %4032 = vmatmul.mubr.bf16.gmra.mrb[40].mxu0 %v1464_v63  ;;  %vm6157_vm1 = vmmov %vm6154_vm0 }
 0x28c   :  { %4035 = vmatprep.mubr.msk.bf16.mxu0 %vm6121_vm15, %v4958_v23 }
 0x28d   :  { %4320 = vmatmul.mubr.bf16.gmra.mrb[20].mxu1 %v5534_v58  ;;  %v5928_v58 = vld [vmem:[#allocation2 + $0x48] sm:$0xff] }
 0x28e   :  { %4323 = vmatprep.mubr.msk.bf16.mxu1 %vm6121_vm15, %v4958_v23  ;;  %v1467_v40 = vrot.slane %v5928_v58, 5  ;;  %v2939_v17 = vrot.slane %v5928_v58, 3 }
 0x290   :  { %v1468_v46 = vsel %vm6143_vm9, %v1465_v27, %v1467_v40  ;;  %v1470_v33 = vsel %vm6144_vm2, %v1467_v40, %v1469_v9  ;;  %v2940_v13 = vsel %vm6155_vm14, %v2937_v43, %v2939_v17  ;;  %vm6158_vm9 = vmmov %vm6154_vm0 }
 0x291   :  { %vm6159_vm2 = vmmov %vm6154_vm0 }
 0x293   :  { %4036 = vmatmul.mubr.bf16.gmra.mrb[44].mxu0 %v1466_v4 }
 0x294   :  { %4039 = vmatprep.mubr.msk.bf16.mxu0 %vm6121_vm15, %v4958_v23 }
 0x295   :  { %4324 = vmatmul.mubr.bf16.gmra.mrb[24].mxu1 %v2681_v11 }
 0x296   :  { %4327 = vmatprep.mubr.msk.bf16.mxu1 %vm6121_vm15, %v4958_v23 }
 0x29b   :  { %4040 = vmatmul.mubr.bf16.gmra.mrb[48].mxu0 %v1468_v46 }
 0x29c   :  { %4043 = vmatprep.mubr.msk.bf16.mxu0 %vm6121_vm15, %v4958_v23 }
 0x29d   :  { %4328 = vmatmul.mubr.bf16.gmra.mrb[28].mxu1 %v2680_v51 }
 0x29e   :  { %4347 = vmatprep.mubr.msk.bf16.mxu1 %vm6121_vm15, %v4958_v23 }
 0x2a3   :  { %4044 = vmatmul.mubr.bf16.gmra.mrb[52].mxu0 %v1470_v33 }
 0x2a4   :  { %4047 = vmatprep.mubr.msk.bf16.mxu0 %vm6121_vm15, %v4958_v23 }
 0x2a5   :  { %4348 = vmatmul.mubr.bf16.vlgmr.msra.gmra.mrb[32].mxu1 %v2926_v59 }
 0x2a6   :  { %4351 = vmatprep.mubr.msk.bf16.mxu1 %vm6121_vm15, %v4958_v23 }
 0x2ab   :  { %4048 = vmatmul.mubr.bf16.gmra.mrb[56].mxu0 %v1472_v36 }
 0x2ac   :  { %4051 = vmatprep.mubr.msk.bf16.mxu0 %vm6121_vm15, %v4958_v23 }
 0x2ad   :  { %4352 = vmatmul.mubr.bf16.gmra.mrb[36].mxu1 %v2928_v60 }
 0x2ae   :  { %4355 = vmatprep.mubr.msk.bf16.mxu1 %vm6121_vm15, %v4958_v23 }
 0x2b3   :  { %4052 = vmatmul.mubr.bf16.gmra.mrb[60].mxu0 %v1474_v55 }
 0x2b4   :  { %4055 = vmatprep.mubr.msk.bf16.mxu0 %vm6121_vm15, %v4958_v23 }
 0x2b5   :  { %4356 = vmatmul.mubr.bf16.gmra.mrb[40].mxu1 %v2930_v1 }
 0x2b6   :  { %4359 = vmatprep.mubr.msk.bf16.mxu1 %vm6121_vm15, %v4958_v23 }
 0x2bb   :  { %4056 = vmatmul.mubr.bf16.gmra.mrb[64].mxu0 %v1476_v3 }
 0x2bc   :  { %4075 = vmatprep.mubr.msk.bf16.mxu0 %vm6121_vm15, %v4958_v23 }
 0x2bd   :  { %4360 = vmatmul.mubr.bf16.gmra.mrb[44].mxu1 %v2932_v57 }
 0x2be   :  { %4363 = vmatprep.mubr.msk.bf16.mxu1 %vm6121_vm15, %v4958_v23 }
 0x2c3   :  { %4076 = vmatmul.mubr.bf16.vlgmr.msra.gmra.mrb[16].mxu0 %v1733_v38 }
 0x2c4   :  { %4079 = vmatprep.mubr.msk.bf16.mxu0 %vm6121_vm15, %v4958_v23 }
 0x2c5   :  { %4364 = vmatmul.mubr.bf16.gmra.mrb[48].mxu1 %v2934_v24 }
 0x2c6   :  { %4367 = vmatprep.mubr.msk.bf16.mxu1 %vm6121_vm15, %v4958_v23 }
 0x2cb   :  { %4080 = vmatmul.mubr.bf16.gmra.mrb[20].mxu0 %v1742_v31 }
 0x2cc   :  { %4083 = vmatprep.mubr.msk.bf16.mxu0 %vm6121_vm15, %v4958_v23 }
 0x2cd   :  { %4368 = vmatmul.mubr.bf16.gmra.mrb[0].mxu1 %v2936_v39 }
 0x2ce   :  { %4371 = vmatprep.mubr.msk.bf16.mxu1 %vm6121_vm15, %v4958_v23 }
 0x2d3   :  { %4084 = vmatmul.mubr.bf16.gmra.mrb[24].mxu0 %v5560_v41  ;;  %v2941_v41 = vrot.slane %v5936_v48, 3 }
 0x2d4   :  { %4087 = vmatprep.mubr.msk.bf16.mxu0 %vm6121_vm15, %v4958_v23 }
 0x2d5   :  { %4372 = vmatmul.mubr.bf16.gmra.mrb[4].mxu1 %v2938_v45  ;;  %v2942_v53 = vsel %vm6156_vm6, %v2939_v17, %v2941_v41 }
 0x2d6   :  { %4375 = vmatprep.mubr.msk.bf16.mxu1 %vm6121_vm15, %v4958_v23 }
 0x2db   :  { %4088 = vmatmul.mubr.bf16.gmra.mrb[28].mxu0 %v5564_v5  ;;  %v2943_v5 = vrot.slane %v5946_v8, 3 }
 0x2dc   :  { %4091 = vmatprep.mubr.msk.bf16.mxu0 %vm6121_vm15, %v4958_v23 }
 0x2dd   :  { %4376 = vmatmul.mubr.bf16.gmra.mrb[8].mxu1 %v2940_v13  ;;  %v2944_v37 = vsel %vm6157_vm1, %v2941_v41, %v2943_v5  ;;  %v2946_v2 = vsel %vm6158_vm9, %v2943_v5, %v2945_v18 }
 0x2de   :  { %4379 = vmatprep.mubr.msk.bf16.mxu1 %vm6121_vm15, %v4958_v23 }
 0x2e3   :  { %4092 = vmatmul.mubr.bf16.gmra.mrb[32].mxu0 %v5568_v6  ;;  %v2947_v6 = vrot.slane %v5900_v62, 3 }
 0x2e5   :  { %4380 = vmatmul.mubr.bf16.gmra.mrb[12].mxu1 %v2942_v53  ;;  %v2948_v30 = vsel %vm6159_vm2, %v2945_v18, %v2947_v6 }
 0x2e6   :  { %4383 = vmatprep.mubr.msk.bf16.mxu1 %vm6121_vm15, %v4958_v23 }
 0x2ed   :  { %4384 = vmatmul.mubr.bf16.gmra.mrb[16].mxu1 %v2944_v37 }
 0x2ee   :  { %4387 = vmatprep.mubr.msk.bf16.mxu1 %vm6121_vm15, %v4958_v23 }
 0x2f5   :  { %4388 = vmatmul.mubr.bf16.gmra.mrb[20].mxu1 %v2946_v2 }
 0x2f6   :  { %4391 = vmatprep.mubr.msk.bf16.mxu1 %vm6121_vm15, %v4958_v23 }
 0x2fd   :  { %4392 = vmatmul.mubr.bf16.gmra.mrb[24].mxu1 %v2948_v30 }
 0x2fe   :  { %4395 = vmatprep.mubr.msk.bf16.mxu1 %vm6121_vm15, %v4958_v23 }
 0x305   :  { %4396 = vmatmul.mubr.bf16.gmra.mrb[28].mxu1 %v2947_v6 }
 0x356   :  { %v6021_v15 = vpop.f32.mrb[36].mxu0 }
 0x357   :  { %v4029_v22 = vpop.f32.mrb[37].mxu0 }
 0x358   :  { %v6023_v28 = vpop.f32.mrb[38].mxu0 }
 0x359   :  { %v4030_v0 = vpop.f32.mrb[39].mxu0 }
 0x35e   :  { %v6025_v63 = vpop.f32.mrb[40].mxu0 }
 0x35f   :  { %v4033_v51 = vpop.f32.mrb[41].mxu0 }
 0x360   :  { %v6027_v29 = vpop.f32.mrb[42].mxu0 }
 0x361   :  { %v4034_v27 = vpop.f32.mrb[43].mxu0 }
 0x366   :  { %v6029_v62 = vpop.f32.mrb[44].mxu0 }
 0x367   :  { %v4037_v11 = vpop.f32.mrb[45].mxu0 }
 0x368   :  { %v6031_v4 = vpop.f32.mrb[46].mxu0 }
 0x369   :  { %v4038_v58 = vpop.f32.mrb[47].mxu0 }
 0x36e   :  { %v6033_v23 = vpop.f32.mrb[48].mxu0 }
 0x36f   :  { %v4041_v40 = vpop.f32.mrb[49].mxu0 }
 0x370   :  { %v6035_v46 = vpop.f32.mrb[50].mxu0 }
 0x371   :  { %v4042_v47 = vpop.f32.mrb[51].mxu0 }
 0x376   :  { %v6037_v48 = vpop.f32.mrb[52].mxu0 }
 0x377   :  { %v4045_v9 = vpop.f32.mrb[53].mxu0 }
 0x378   :  { %v3044_v50 = vpop.f32.mrb[32].mxu1  ;;  %v6039_v32 = vpop.f32.mrb[54].mxu0 }
 0x379   :  { %v4349_v33 = vpop.f32.mrb[33].mxu1  ;;  %v4046_v59 = vpop.f32.mrb[55].mxu0 }
 0x37a   :  { %v3047_v8 = vpop.f32.mrb[34].mxu1 }
 0x37b   :  { %v4350_v52 = vpop.f32.mrb[35].mxu1 }
 0x37e   :  { %v6041_v12 = vpop.f32.mrb[56].mxu0 }
 0x37f   :  { %v4049_v36 = vpop.f32.mrb[57].mxu0 }
 0x380   :  { %v3052_v60 = vpop.f32.mrb[36].mxu1  ;;  %v6043_v26 = vpop.f32.mrb[58].mxu0 }
 0x381   :  { %v4353_v42 = vpop.f32.mrb[37].mxu1  ;;  %v4050_v49 = vpop.f32.mrb[59].mxu0 }
 0x382   :  { %v3055_v55 = vpop.f32.mrb[38].mxu1 }
 0x383   :  { %v4354_v1 = vpop.f32.mrb[39].mxu1 }
 0x386   :  { %v6045_v35 = vpop.f32.mrb[60].mxu0 }
 0x387   :  { %v4053_v54 = vpop.f32.mrb[61].mxu0 }
 0x388   :  { %v3060_v56 = vpop.f32.mrb[40].mxu1  ;;  %v6047_v16 = vpop.f32.mrb[62].mxu0 }
 0x389   :  { %v4357_v25 = vpop.f32.mrb[41].mxu1  ;;  %v4054_v44 = vpop.f32.mrb[63].mxu0 }
 0x38a   :  { %v3063_v3 = vpop.f32.mrb[42].mxu1 }
 0x38b   :  { %v4358_v19 = vpop.f32.mrb[43].mxu1 }
 0x38e   :  { %v6049_v14 = vpop.f32.mrb[64].mxu0 }
 0x38f   :  { %v4057_v10 = vpop.f32.mrb[65].mxu0 }
 0x390   :  { %v3068_v61 = vpop.f32.mrb[44].mxu1  ;;  %v1671_v57 = vpop.f32.mrb[66].mxu0 }
 0x391   :  { %v4361_v34 = vpop.f32.mrb[45].mxu1  ;;  %v4058_v7 = vpop.f32.mrb[67].mxu0 }
 0x392   :  { %v3071_v21 = vpop.f32.mrb[46].mxu1 }
 0x393   :  { %v4362_v38 = vpop.f32.mrb[47].mxu1 }
 0x396   :  { %v1937_v24 = vpop.f32.mrb[16].mxu0 }
 0x397   :  { %v4415_v20 = vadd.f32 %v3044_v50, %v1937_v24  ;;  %v4077_v31 = vpop.f32.mrb[17].mxu0 }
 0x398   :  { %v3076_v39 = vpop.f32.mrb[48].mxu1  ;;  %v1940_v43 = vpop.f32.mrb[18].mxu0 }
 0x399   :  { %v4365_v45 = vpop.f32.mrb[49].mxu1  ;;  %v4416_v17 = vadd.f32 %v3047_v8, %v1940_v43  ;;  %v4078_v13 = vpop.f32.mrb[19].mxu0 }
 0x39a   :  { %v3079_v41 = vpop.f32.mrb[50].mxu1 }
 0x39b   :  { %v4366_v53 = vpop.f32.mrb[51].mxu1  ;;  %v3487_v5 = vpack.c.bf16 %v4416_v17, %v4415_v20 }
 0x39d   :  { %3488 = vst [vmem:[#allocation6] sm:$0xff] %v3487_v5  }
 0x39e   :  { %v1945_v37 = vpop.f32.mrb[20].mxu0 }
 0x39f   :  { %v4417_v18 = vadd.f32 %v3052_v60, %v1945_v37  ;;  %v4081_v2 = vpop.f32.mrb[21].mxu0 }
 0x3a0   :  { %v3084_v6 = vpop.f32.mrb[0].mxu1  ;;  %v1948_v30 = vpop.f32.mrb[22].mxu0 }
 0x3a1   :  { %v4425_v22 = vadd.f32 %v3084_v6, %v6021_v15  ;;  %v4369_v0 = vpop.f32.mrb[1].mxu1  ;;  %v4418_v51 = vadd.f32 %v3055_v55, %v1948_v30  ;;  %v4082_v27 = vpop.f32.mrb[23].mxu0 }
 0x3a2   :  { %v3087_v11 = vpop.f32.mrb[2].mxu1 }
 0x3a3   :  { %v4426_v58 = vadd.f32 %v3087_v11, %v6023_v28  ;;  %v4370_v40 = vpop.f32.mrb[3].mxu1  ;;  %v3492_v47 = vpack.c.bf16 %v4418_v51, %v4417_v18 }
 0x3a5   :  { %v3512_v9 = vpack.c.bf16 %v4426_v58, %v4425_v22  ;;  %3551 = vst [vmem:[#allocation6 + $0x8] sm:$0xff] %v3492_v47  }
 0x3a6   :  { %v1953_v50 = vpop.f32.mrb[24].mxu0 }
 0x3a7   :  { %3555 = vst [vmem:[#allocation6 + $0x28] sm:$0xff] %v3512_v9   ;;  %v4419_v33 = vadd.f32 %v3060_v56, %v1953_v50  ;;  %v4085_v59 = vpop.f32.mrb[25].mxu0 }
 0x3a8   :  { %v3092_v8 = vpop.f32.mrb[4].mxu1  ;;  %v1956_v52 = vpop.f32.mrb[26].mxu0 }
 0x3a9   :  { %v4427_v36 = vadd.f32 %v3092_v8, %v6025_v63  ;;  %v4373_v60 = vpop.f32.mrb[5].mxu1  ;;  %v4420_v15 = vadd.f32 %v3063_v3, %v1956_v52  ;;  %v4086_v42 = vpop.f32.mrb[27].mxu0 }
 0x3aa   :  { %v3095_v49 = vpop.f32.mrb[6].mxu1 }
 0x3ab   :  { %v4428_v55 = vadd.f32 %v3095_v49, %v6027_v29  ;;  %v4374_v1 = vpop.f32.mrb[7].mxu1  ;;  %v3497_v28 = vpack.c.bf16 %v4420_v15, %v4419_v33 }
 0x3ad   :  { %v3517_v54 = vpack.c.bf16 %v4428_v55, %v4427_v36  ;;  %3552 = vst [vmem:[#allocation6 + $0x10] sm:$0xff] %v3497_v28  }
 0x3ae   :  { %v1961_v25 = vpop.f32.mrb[28].mxu0 }
 0x3af   :  { %3556 = vst [vmem:[#allocation6 + $0x30] sm:$0xff] %v3517_v54   ;;  %v4421_v44 = vadd.f32 %v3068_v61, %v1961_v25  ;;  %v4089_v19 = vpop.f32.mrb[29].mxu0 }
 0x3b0   :  { %v3100_v56 = vpop.f32.mrb[8].mxu1  ;;  %v1964_v10 = vpop.f32.mrb[30].mxu0 }
 0x3b1   :  { %v4429_v57 = vadd.f32 %v3100_v56, %v6029_v62  ;;  %v4377_v34 = vpop.f32.mrb[9].mxu1  ;;  %v4422_v63 = vadd.f32 %v3071_v21, %v1964_v10  ;;  %v4090_v7 = vpop.f32.mrb[31].mxu0 }
 0x3b2   :  { %v3103_v3 = vpop.f32.mrb[10].mxu1 }
 0x3b3   :  { %v4430_v38 = vadd.f32 %v3103_v3, %v6031_v4  ;;  %v4378_v24 = vpop.f32.mrb[11].mxu1  ;;  %v3502_v29 = vpack.c.bf16 %v4422_v63, %v4421_v44 }
 0x3b5   :  { %v3522_v20 = vpack.c.bf16 %v4430_v38, %v4429_v57  ;;  %3553 = vst [vmem:[#allocation6 + $0x18] sm:$0xff] %v3502_v29  }
 0x3b6   :  { %v1969_v31 = vpop.f32.mrb[32].mxu0 }
 0x3b7   :  { %3557 = vst [vmem:[#allocation6 + $0x38] sm:$0xff] %v3522_v20   ;;  %v4423_v43 = vadd.f32 %v3076_v39, %v1969_v31  ;;  %v4093_v45 = vpop.f32.mrb[33].mxu0 }
 0x3b8   :  { %v3108_v61 = vpop.f32.mrb[12].mxu1  ;;  %v1972_v17 = vpop.f32.mrb[34].mxu0 }
 0x3b9   :  { %v4431_v13 = vadd.f32 %v3108_v61, %v6033_v23  ;;  %v4381_v53 = vpop.f32.mrb[13].mxu1  ;;  %v4424_v62 = vadd.f32 %v3079_v41, %v1972_v17  ;;  %v4094_v5 = vpop.f32.mrb[35].mxu0 }
 0x3ba   :  { %v3111_v21 = vpop.f32.mrb[14].mxu1 }
 0x3bb   :  { %v4432_v37 = vadd.f32 %v3111_v21, %v6035_v46  ;;  %v4382_v18 = vpop.f32.mrb[15].mxu1  ;;  %v3507_v4 = vpack.c.bf16 %v4424_v62, %v4423_v43 }
 0x3bd   :  { %v3527_v2 = vpack.c.bf16 %v4432_v37, %v4431_v13  ;;  %3554 = vst [vmem:[#allocation6 + $0x20] sm:$0xff] %v3507_v4  }
 0x3bf   :  { %3558 = vst [vmem:[#allocation6 + $0x40] sm:$0xff] %v3527_v2  }
 0x3c0   :  { %v3116_v6 = vpop.f32.mrb[16].mxu1 }
 0x3c1   :  { %v4433_v30 = vadd.f32 %v3116_v6, %v6037_v48  ;;  %v4385_v39 = vpop.f32.mrb[17].mxu1 }
 0x3c2   :  { %v3119_v22 = vpop.f32.mrb[18].mxu1 }
 0x3c3   :  { %v4434_v0 = vadd.f32 %v3119_v22, %v6039_v32  ;;  %v4386_v51 = vpop.f32.mrb[19].mxu1 }
 0x3c5   :  { %v3532_v23 = vpack.c.bf16 %v4434_v0, %v4433_v30 }
 0x3c7   :  { %3559 = vst [vmem:[#allocation6 + $0x48] sm:$0xff] %v3532_v23  }
 0x3c8   :  { %v3124_v41 = vpop.f32.mrb[20].mxu1 }
 0x3c9   :  { %v4435_v27 = vadd.f32 %v3124_v41, %v6041_v12  ;;  %v4389_v11 = vpop.f32.mrb[21].mxu1 }
 0x3ca   :  { %v3127_v46 = vpop.f32.mrb[22].mxu1 }
 0x3cb   :  { %v4436_v58 = vadd.f32 %v3127_v46, %v6043_v26  ;;  %v4390_v40 = vpop.f32.mrb[23].mxu1 }
 0x3cd   :  { %v3537_v47 = vpack.c.bf16 %v4436_v58, %v4435_v27 }
 0x3cf   :  { %3560 = vst [vmem:[#allocation6 + $0x50] sm:$0xff] %v3537_v47  }
 0x3d0   :  { %v3132_v9 = vpop.f32.mrb[24].mxu1 }
 0x3d1   :  { %v4437_v48 = vadd.f32 %v3132_v9, %v6045_v35  ;;  %v4393_v50 = vpop.f32.mrb[25].mxu1 }
 0x3d2   :  { %v3135_v33 = vpop.f32.mrb[26].mxu1 }
 0x3d3   :  { %v4438_v32 = vadd.f32 %v3135_v33, %v6047_v16  ;;  %v4394_v59 = vpop.f32.mrb[27].mxu1 }
 0x3d5   :  { %v3542_v8 = vpack.c.bf16 %v4438_v32, %v4437_v48 }
 0x3d7   :  { %3561 = vst [vmem:[#allocation6 + $0x58] sm:$0xff] %v3542_v8  }
 0x3d8   :  { %v3140_v52 = vpop.f32.mrb[28].mxu1 }
 0x3d9   :  { %v4439_v12 = vadd.f32 %v3140_v52, %v6049_v14  ;;  %v4397_v36 = vpop.f32.mrb[29].mxu1 }
 0x3da   :  { %v3143_v26 = vpop.f32.mrb[30].mxu1 }
 0x3db   :  { %v3451_v60 = vpack.c.bf16 %v4439_v12, %v4439_v12  ;;  %v4398_v15 = vpop.f32.mrb[31].mxu1 }
 0x3dd   :  { %3296 = vst [vmem:[#allocation6 + $0x60] sm:$0xf] %v3451_v60 }
 0x3de   :  { %4940 = shalt.err (!%p4937_p12)
}
 0x3df   :  { %s4941_s23 = scalar_lea.hbm %s6088_s7, 1600 }
 0x3e0   :  { %p4942_p13 = scmp.ne.s32.totalorder %s6088_s7, %s4941_s23  ;;  %p4945_p0 = scmp.lt.u32.totalorder %s4941_s23, %s6088_s7 }
 0x3e2   :  { %p4947_p1 = pnand %p4945_p0, %p4942_p13 }
 0x3e4   :  { %4950 = shalt.err (!%p4947_p1)
}
 0x3e5   :  { %3308 = dma.vmem_to_hbm [thread:$0]  %s3303_s5, 1600, %s6088_s7, [#allocation5], %s4956_s11, %s4956_s11, %s4957_s12  }
 0x3e6   :  { %4953 = dma.done.wait [#allocation5], 1600  }
 0x3e7   :  { %4954 = vsyncadd [#allocation5], 4294965696 }
 0x3e8   :  { %3312 = vsyncpa [#allocation4], 1 }
 0x3e9   :  { %3313 = vsyncpa [#allocation5], 1 }

</bundles_post_ra>
